<compile_context>
chip_gen: v7x
topology: tpu7x:2x2x1
jax: 0.10.0
libtpu: 0.0.40
codegen_flags: <defaults>
</compile_context>

<pallas_src>
import functools

import jax
import jax.numpy as jnp
from jax.experimental import pallas as pl
from jax.experimental.pallas import tpu as pltpu


# ---------------------------------------------------------------------------
# Kernel 1: LayerNorm + full-width Q / KV projections + per-head QK-RMSNorm.
# ---------------------------------------------------------------------------
def _proj_kernel(x_ref, ln_g_ref, ln_b_ref, wq_ref, wkv_ref, qg_ref, kg_ref,
                 q_out_ref, k_out_ref, v_out_ref, *, heads, dim_head):
    inner = heads * dim_head

    # LayerNorm in f32 (eps matches F.layer_norm); bf16 result for the MXU.
    x = x_ref[0].astype(jnp.float32)                                  # (t, D)
    mu = jnp.mean(x, axis=-1, keepdims=True)
    var = jnp.mean(jnp.square(x - mu), axis=-1, keepdims=True)
    xn = (x - mu) * jax.lax.rsqrt(var + 1e-5)
    xn = (xn * ln_g_ref[0] + ln_b_ref[0]).astype(jnp.bfloat16)

    # Lane-dense projections: one (t,D)@(D,inner) + one (t,D)@(D,2*inner) matmul
    # per tile (f32 accumulation) instead of per-head skinny matmuls.
    q = jnp.dot(xn, wq_ref[...], preferred_element_type=jnp.float32)    # (t, inner)
    kv = jnp.dot(xn, wkv_ref[...], preferred_element_type=jnp.float32)  # (t, 2*inner)

    v_out_ref[0] = kv[:, inner:].astype(jnp.bfloat16)

    qg = qg_ref[...]                                  # (1, inner), already *sqrt(dh)
    kg = kg_ref[...]
    # Per-head RMSNorm; `heads` is a small compile-time constant, so this unrolls
    # into static lane slices (no in-kernel reshape / transpose / concatenate).
    for hh in range(heads):
        sl = slice(hh * dim_head, (hh + 1) * dim_head)
        qh = q[:, sl]
        kh = kv[:, sl]
        qn = qh / jnp.maximum(
            jnp.sqrt(jnp.sum(qh * qh, axis=-1, keepdims=True)), 1e-12)
        kn = kh / jnp.maximum(
            jnp.sqrt(jnp.sum(kh * kh, axis=-1, keepdims=True)), 1e-12)
        q_out_ref[0, :, sl] = (qn * qg[:, sl]).astype(jnp.bfloat16)
        k_out_ref[0, :, sl] = (kn * kg[:, sl]).astype(jnp.bfloat16)


# ---------------------------------------------------------------------------
# Kernel 2: flash attention (per-head online softmax) + fused output projection.
# Grid: (B, q-tiles, heads, kv-tiles).
# ---------------------------------------------------------------------------
def _flash_kernel(q_ref, k_ref, v_ref, wo_ref, o_ref,
                  m_scr, l_scr, acc_scr, oall_scr,
                  *, heads, dim_head, kv_valid, mask_kv):
    h = pl.program_id(2)
    ki = pl.program_id(3)
    nk = pl.num_programs(3)

    @pl.when(ki == 0)
    def _init():
        m_scr[...] = jnp.full(m_scr.shape, -jnp.inf, jnp.float32)
        l_scr[...] = jnp.zeros(l_scr.shape, jnp.float32)
        acc_scr[...] = jnp.zeros(acc_scr.shape, jnp.float32)

    q = q_ref[0, 0]                                                 # (tq, dh) bf16
    k = k_ref[0, 0]                                                 # (tk, dh) bf16
    v = v_ref[0, 0]                                                 # (tk, dh) bf16

    s = jax.lax.dot_general(q, k, (((1,), (1,)), ((), ())),
                            preferred_element_type=jnp.float32)     # (tq, tk) f32
    if mask_kv:  # static: only emitted when N was padded up to the kv tile
        tk = s.shape[1]
        col = jax.lax.broadcasted_iota(jnp.int32, s.shape, 1) + ki * tk
        s = jnp.where(col < kv_valid, s, -1e30)

    m_prev = m_scr[...]
    m_new = jnp.maximum(m_prev, jnp.max(s, axis=-1, keepdims=True))
    alpha = jnp.exp(m_prev - m_new)
    p = jnp.exp(s - m_new)                                          # f32
    l_scr[...] = alpha * l_scr[...] + jnp.sum(p, axis=-1, keepdims=True)
    acc_scr[...] = alpha * acc_scr[...] + jnp.dot(
        p.astype(jnp.bfloat16), v, preferred_element_type=jnp.float32)
    m_scr[...] = m_new

    # Once per (b, q-tile, head): normalize and stash this head's output columns.
    @pl.when(ki == nk - 1)
    def _finalize_head():
        out_h = (acc_scr[...] * pl.reciprocal(l_scr[...], approx=True)
                 ).astype(jnp.bfloat16)                             # (tq, dh)
        for hh in range(heads):                                     # static unroll
            @pl.when(h == hh)
            def _(hh=hh):
                oall_scr[:, hh * dim_head:(hh + 1) * dim_head] = out_h

    # Once per (b, q-tile): ONE lane-dense (tq, inner) @ (inner, D) out-projection.
    @pl.when((ki == nk - 1) & (h == heads - 1))
    def _write_out():
        o_ref[0] = jnp.dot(oall_scr[...], wo_ref[...],
                           preferred_element_type=jnp.float32).astype(o_ref.dtype)

    # TODO(synk): optional `mask` / `attn_mask` / `context` arguments (None in this
    # forward path) and dropout (p=0.0) are not implemented.


# ---------------------------------------------------------------------------
# Wrapper
# ---------------------------------------------------------------------------
def attention_pallas(x, params, *, heads, dim_head, tq=None, tk=None,
                     single_buffer_weights=True):
    B, N, D = x.shape
    inner = heads * dim_head
    scale = float(dim_head) ** 0.5

    # ---- tiles: decoupled, default 256 (good for v5e/v6e/v7x MXU widths).
    #      v5e can be swept down to tk=128 if vld/vst-slot bound.
    def _auto(n):
        return 256 if n >= 256 else max(8, -(-n // 8) * 8)
    tq = _auto(N) if tq is None else tq
    tk = _auto(N) if tk is None else tk
    t_pad = max(tq, tk)
    n_pad = -(-N // t_pad) * t_pad
    assert n_pad % tq == 0 and n_pad % tk == 0, (tq, tk, n_pad)
    mask_kv = n_pad != N
    t_proj = tq

    # ---- host-side weight prep (bf16 MXU operands, sqrt(dh) folded into gammas).
    wq = params["wq"].astype(jnp.bfloat16)                     # (D, inner)
    wkv = params["wkv"].astype(jnp.bfloat16)                   # (D, 2*inner)
    wo = params["wo"].astype(jnp.bfloat16)                     # (inner, D)
    ln_g = params["ln_gamma"].reshape(1, D).astype(jnp.float32)
    ln_b = params["ln_beta"].reshape(1, D).astype(jnp.float32)
    qg = (params["q_gamma"] * scale).reshape(1, inner).astype(jnp.float32)
    kg = (params["k_gamma"] * scale).reshape(1, inner).astype(jnp.float32)

    xb = x.astype(jnp.bfloat16)                                # halve x HBM traffic
    if mask_kv:
        xb = jnp.pad(xb, ((0, 0), (0, n_pad - N), (0, 0)))

    # Single-buffer the constant-index (resident) weights when supported.
    wmode = pl.Buffered(buffer_count=1) if single_buffer_weights else None

    def const_spec(shape):
        zeros = (0,) * len(shape)
        if wmode is None:
            return pl.BlockSpec(shape, lambda *_: zeros)
        return pl.BlockSpec(shape, lambda *_: zeros, pipeline_mode=wmode)

    nbuf = 1 if single_buffer_weights else 2

    # ---------------- pass 1: LN + projections + QK-RMSNorm ----------------
    proj_need = (nbuf * 2 * (D * inner + D * 2 * inner)       # bf16 weights
                 + nbuf * 4 * (2 * D + 2 * inner)             # f32 gammas
                 + 2 * 2 * t_proj * D                         # x blocks (bf16, x2)
                 + 2 * 3 * 2 * t_proj * inner)                # q/k/v out blocks
    proj_vmem = int(min(64 << 20, max(16 << 20, 2 * proj_need)))

    qkv_shape = jax.ShapeDtypeStruct((B, n_pad, inner), jnp.bfloat16)
    q, k, v = pl.pallas_call(
        functools.partial(_proj_kernel, heads=heads, dim_head=dim_head),
        out_shape=(qkv_shape, qkv_shape, qkv_shape),
        grid_spec=pltpu.PrefetchScalarGridSpec(
            num_scalar_prefetch=0,
            grid=(B, n_pad // t_proj),
            in_specs=[
                pl.BlockSpec((1, t_proj, D), lambda b, i: (b, i, 0)),   # x tile
                const_spec((1, D)),                                     # LN gamma
                const_spec((1, D)),                                     # LN beta
                const_spec((D, inner)),                                 # Wq
                const_spec((D, 2 * inner)),                             # Wkv
                const_spec((1, inner)),                                 # q gamma*scale
                const_spec((1, inner)),                                 # k gamma*scale
            ],
            out_specs=(
                pl.BlockSpec((1, t_proj, inner), lambda b, i: (b, i, 0)),
                pl.BlockSpec((1, t_proj, inner), lambda b, i: (b, i, 0)),
                pl.BlockSpec((1, t_proj, inner), lambda b, i: (b, i, 0)),
            ),
        ),
        compiler_params=pltpu.CompilerParams(
            dimension_semantics=("parallel", "parallel"),
            vmem_limit_bytes=proj_vmem),
    )(xb, ln_g, ln_b, wq, wkv, qg, kg)

    # Head-major layout so the flash kernel DMAs exact (tile, dh) slices.
    def to_heads(a):  # (B, n_pad, inner) -> (B, heads, n_pad, dh)
        return jnp.transpose(a.reshape(B, n_pad, heads, dim_head), (0, 2, 1, 3))
    qh, kh, vh = to_heads(q), to_heads(k), to_heads(v)

    # ---------------- pass 2: flash attention + fused out-projection -------
    nq, nk = n_pad // tq, n_pad // tk
    flash_need = (nbuf * 2 * inner * D                         # Wo
                  + 2 * 2 * (tq + 2 * tk) * dim_head           # q/k/v blocks (bf16, x2)
                  + 2 * 4 * tq * D                             # out blocks (f32, x2)
                  + 4 * tq * (dim_head + 2) + 2 * tq * inner)  # scratch
    flash_vmem = int(min(64 << 20, max(16 << 20, 2 * flash_need)))

    out = pl.pallas_call(
        functools.partial(_flash_kernel, heads=heads, dim_head=dim_head,
                          kv_valid=N, mask_kv=mask_kv),
        out_shape=jax.ShapeDtypeStruct((B, n_pad, D), jnp.float32),
        grid_spec=pltpu.PrefetchScalarGridSpec(
            num_scalar_prefetch=0,
            grid=(B, nq, heads, nk),
            in_specs=[
                pl.BlockSpec((1, 1, tq, dim_head),
                             lambda b, qi, h, ki: (b, h, qi, 0)),       # q
                pl.BlockSpec((1, 1, tk, dim_head),
                             lambda b, qi, h, ki: (b, h, ki, 0)),       # k
                pl.BlockSpec((1, 1, tk, dim_head),
                             lambda b, qi, h, ki: (b, h, ki, 0)),       # v
                const_spec((inner, D)),                                 # Wo (resident)
            ],
            out_specs=pl.BlockSpec((1, tq, D), lambda b, qi, h, ki: (b, qi, 0)),
            scratch_shapes=[
                pltpu.VMEM((tq, 1), jnp.float32),          # running max m
                pltpu.VMEM((tq, 1), jnp.float32),          # running sum l
                pltpu.VMEM((tq, dim_head), jnp.float32),   # single-head accumulator
                pltpu.VMEM((tq, inner), jnp.bfloat16),     # all-head output (pre-Wo)
            ],
        ),
        compiler_params=pltpu.CompilerParams(
            dimension_semantics=("parallel", "parallel", "arbitrary", "arbitrary"),
            vmem_limit_bytes=flash_vmem),
    )(qh, kh, vh, wo)

    return out[:, :N, :] if mask_kv else out


# ---------------------------------------------------------------------------
# Pure-JAX (f32) reference mirroring the PyTorch forward exactly.
# ---------------------------------------------------------------------------
def attention_reference(x, params, *, heads, dim_head):
    B, N, D = x.shape
    inner = heads * dim_head
    mu = jnp.mean(x, axis=-1, keepdims=True)
    var = jnp.mean((x - mu) ** 2, axis=-1, keepdims=True)
    xn = (x - mu) / jnp.sqrt(var + 1e-5)
    xn = xn * params["ln_gamma"] + params["ln_beta"]

    q = xn @ params["wq"]
    kv = xn @ params["wkv"]
    k, v = kv[..., :inner], kv[..., inner:]

    def split(t):  # b n (h d) -> b h n d
        return jnp.transpose(t.reshape(B, N, heads, dim_head), (0, 2, 1, 3))

    q, k, v = split(q), split(k), split(v)
    scale = dim_head ** 0.5

    def rmsnorm(t, g):
        nrm = jnp.maximum(jnp.sqrt(jnp.sum(t * t, axis=-1, keepdims=True)), 1e-12)
        return (t / nrm) * scale * g[None]          # g: (heads, 1, dim_head)

    q = rmsnorm(q, params["q_gamma"])
    k = rmsnorm(k, params["k_gamma"])

    dots = jnp.einsum("bhnd,bhmd->bhnm", q, k)
    attn = jax.nn.softmax(dots, axis=-1)
    out = jnp.einsum("bhnm,bhmd->bhnd", attn, v)
    out = jnp.transpose(out, (0, 2, 1, 3)).reshape(B, N, inner)
    return out @ params["wo"]


if __name__ == "__main__":
    def run_case(seed, B, N, dim, heads, dim_head, *, tq=None, tk=None,
                 soft_gamma=False, tol=2e-2):
        inner = heads * dim_head
        key = jax.random.PRNGKey(seed)
        kx, kq, kkv, ko, kg1, kg2, kg3 = jax.random.split(key, 7)
        x = jax.random.normal(kx, (B, N, dim), dtype=jnp.float32)
        if soft_gamma:
            q_gamma = 0.5 + 0.05 * jax.random.normal(kg1, (heads, 1, dim_head))
            k_gamma = 0.5 + 0.05 * jax.random.normal(kg2, (heads, 1, dim_head))
            ln_gamma = 1.0 + 0.1 * jax.random.normal(kg3, (dim,))
        else:  # module defaults: gammas = ones
            q_gamma = jnp.ones((heads, 1, dim_head), jnp.float32)
            k_gamma = jnp.ones((heads, 1, dim_head), jnp.float32)
            ln_gamma = jnp.ones((dim,), jnp.float32)
        params = {
            "ln_gamma": ln_gamma.astype(jnp.float32),
            "ln_beta": jnp.zeros((dim,), jnp.float32),   # registered zeros buffer
            "q_gamma": q_gamma.astype(jnp.float32),
            "k_gamma": k_gamma.astype(jnp.float32),
            "wq": 0.05 * jax.random.normal(kq, (dim, inner), jnp.float32),
            "wkv": 0.05 * jax.random.normal(kkv, (dim, 2 * inner), jnp.float32),
            "wo": 0.05 * jax.random.normal(ko, (inner, dim), jnp.float32),
        }
        try:
            out = jax.block_until_ready(attention_pallas(
                x, params, heads=heads, dim_head=dim_head, tq=tq, tk=tk,
                single_buffer_weights=True))
        except Exception:
            # pl.Buffered(1) not supported on this jax version -> default buffering.
            out = jax.block_until_ready(attention_pallas(
                x, params, heads=heads, dim_head=dim_head, tq=tq, tk=tk,
                single_buffer_weights=False))
        ref = attention_reference(x, params, heads=heads, dim_head=dim_head)
        assert out.shape == (B, N, dim), out.shape
        err = jnp.max(jnp.abs(out - ref))
        assert jnp.allclose(out, ref, atol=tol, rtol=tol), f"max abs diff = {err}"

    # Small shape implied by the module (runs in a blink).
    run_case(0, B=2, N=8, dim=32, heads=2, dim_head=16, tol=2e-2)
    # Multi-q-tile / multi-kv-tile / multi-head / padded-kv path: exercises the
    # online-softmax accumulation, per-head column writes into the fused
    # out-projection scratch, and the kv padding mask.
    run_case(0, B=1, N=120, dim=64, heads=4, dim_head=32, tq=64, tk=64,
             soft_gamma=True, tol=3e-2)

    print("KERNEL_OK")
</pallas_src>

<mosaic_0001>
module attributes {stable_mosaic.version = 11 : i64} {
  func.func @_proj_kernel(%arg0: i32, %arg1: i32, %arg2: memref<1x8x32xbf16, #tpu.memory_space<vmem>>, %arg3: memref<1x32xf32, #tpu.memory_space<vmem>>, %arg4: memref<1x32xf32, #tpu.memory_space<vmem>>, %arg5: memref<32x32xbf16, #tpu.memory_space<vmem>>, %arg6: memref<32x64xbf16, #tpu.memory_space<vmem>>, %arg7: memref<1x32xf32, #tpu.memory_space<vmem>>, %arg8: memref<1x32xf32, #tpu.memory_space<vmem>>, %arg9: memref<1x8x32xbf16, #tpu.memory_space<vmem>>, %arg10: memref<1x8x32xbf16, #tpu.memory_space<vmem>>, %arg11: memref<1x8x32xbf16, #tpu.memory_space<vmem>>) attributes {dimension_semantics = [#tpu.dimension_semantics<parallel>, #tpu.dimension_semantics<parallel>], iteration_bounds = array<i64: 2, 1>, scalar_prefetch = 0 : i64, scratch_operands = 0 : i64, tpu.core_type = #tpu.core_type<tc>, window_params = [{transform_indices = @transform_0, window_bounds = array<i64: 1, 8, 32>}, {pipeline_mode = #tpu.pipeline_mode<synchronous>, transform_indices = @transform_1, window_bounds = array<i64: 1, 32>}, {pipeline_mode = #tpu.pipeline_mode<synchronous>, transform_indices = @transform_2, window_bounds = array<i64: 1, 32>}, {pipeline_mode = #tpu.pipeline_mode<synchronous>, transform_indices = @transform_3, window_bounds = array<i64: 32, 32>}, {pipeline_mode = #tpu.pipeline_mode<synchronous>, transform_indices = @transform_4, window_bounds = array<i64: 32, 64>}, {pipeline_mode = #tpu.pipeline_mode<synchronous>, transform_indices = @transform_5, window_bounds = array<i64: 1, 32>}, {pipeline_mode = #tpu.pipeline_mode<synchronous>, transform_indices = @transform_6, window_bounds = array<i64: 1, 32>}, {transform_indices = @transform_7, window_bounds = array<i64: 1, 8, 32>}, {transform_indices = @transform_8, window_bounds = array<i64: 1, 8, 32>}, {transform_indices = @transform_9, window_bounds = array<i64: 1, 8, 32>}]} {
    %c0 = arith.constant 0 : index
    %c0_0 = arith.constant 0 : index
    %c0_1 = arith.constant 0 : index
    %0 = vector.load %arg2[%c0, %c0_0, %c0_1] : memref<1x8x32xbf16, #tpu.memory_space<vmem>>, vector<1x8x32xbf16>
    %1 = vector.shape_cast %0 : vector<1x8x32xbf16> to vector<8x32xbf16>
    %2 = arith.extf %1 : vector<8x32xbf16> to vector<8x32xf32>
    %cst = arith.constant dense<0.000000e+00> : vector<8xf32>
    %3 = vector.multi_reduction <add>, %2, %cst [1] : vector<8x32xf32> to vector<8xf32>
    %4 = vector.shape_cast %3 : vector<8xf32> to vector<8x1xf32>
    %cst_2 = arith.constant 3.200000e+01 : f32
    %5 = vector.broadcast %cst_2 : f32 to vector<8x1xf32>
    %6 = arith.divf %4, %5 : vector<8x1xf32>
    %7 = vector.broadcast %6 : vector<8x1xf32> to vector<8x32xf32>
    %8 = arith.subf %2, %7 : vector<8x32xf32>
    %9 = arith.mulf %8, %8 : vector<8x32xf32>
    %cst_3 = arith.constant dense<0.000000e+00> : vector<8xf32>
    %10 = vector.multi_reduction <add>, %9, %cst_3 [1] : vector<8x32xf32> to vector<8xf32>
    %11 = vector.shape_cast %10 : vector<8xf32> to vector<8x1xf32>
    %cst_4 = arith.constant 3.200000e+01 : f32
    %12 = vector.broadcast %cst_4 : f32 to vector<8x1xf32>
    %13 = arith.divf %11, %12 : vector<8x1xf32>
    %14 = vector.broadcast %6 : vector<8x1xf32> to vector<8x32xf32>
    %15 = arith.subf %2, %14 : vector<8x32xf32>
    %cst_5 = arith.constant 9.99999974E-6 : f32
    %16 = vector.broadcast %cst_5 : f32 to vector<8x1xf32>
    %17 = arith.addf %13, %16 : vector<8x1xf32>
    %18 = math.rsqrt %17 : vector<8x1xf32>
    %19 = vector.broadcast %18 : vector<8x1xf32> to vector<8x32xf32>
    %20 = arith.mulf %15, %19 : vector<8x32xf32>
    %c0_6 = arith.constant 0 : index
    %c0_7 = arith.constant 0 : index
    %21 = vector.load %arg3[%c0_6, %c0_7] : memref<1x32xf32, #tpu.memory_space<vmem>>, vector<1x32xf32>
    %22 = vector.shape_cast %21 : vector<1x32xf32> to vector<32xf32>
    %23 = vector.shape_cast %22 : vector<32xf32> to vector<1x32xf32>
    %24 = vector.broadcast %23 : vector<1x32xf32> to vector<8x32xf32>
    %25 = arith.mulf %20, %24 : vector<8x32xf32>
    %c0_8 = arith.constant 0 : index
    %c0_9 = arith.constant 0 : index
    %26 = vector.load %arg4[%c0_8, %c0_9] : memref<1x32xf32, #tpu.memory_space<vmem>>, vector<1x32xf32>
    %27 = vector.shape_cast %26 : vector<1x32xf32> to vector<32xf32>
    %28 = vector.shape_cast %27 : vector<32xf32> to vector<1x32xf32>
    %29 = vector.broadcast %28 : vector<1x32xf32> to vector<8x32xf32>
    %30 = arith.addf %25, %29 : vector<8x32xf32>
    %31 = arith.truncf %30 : vector<8x32xf32> to vector<8x32xbf16>
    %c0_10 = arith.constant 0 : index
    %c0_11 = arith.constant 0 : index
    %32 = vector.load %arg5[%c0_10, %c0_11] : memref<32x32xbf16, #tpu.memory_space<vmem>>, vector<32x32xbf16>
    %cst_12 = arith.constant dense<0.000000e+00> : vector<8x32xf32>
    %33 = tpu.matmul %31, %32, %cst_12 {dimension_numbers = #tpu.dot_dimension_numbers<[1], [0], [0], [1], [0, 0, 1, 1], [], []>} : vector<8x32xbf16>, vector<32x32xbf16>, vector<8x32xf32> -> vector<8x32xf32>
    %c0_13 = arith.constant 0 : index
    %c0_14 = arith.constant 0 : index
    %34 = vector.load %arg6[%c0_13, %c0_14] : memref<32x64xbf16, #tpu.memory_space<vmem>>, vector<32x64xbf16>
    %cst_15 = arith.constant dense<0.000000e+00> : vector<8x64xf32>
    %35 = tpu.matmul %31, %34, %cst_15 {dimension_numbers = #tpu.dot_dimension_numbers<[1], [0], [0], [1], [0, 0, 1, 1], [], []>} : vector<8x32xbf16>, vector<32x64xbf16>, vector<8x64xf32> -> vector<8x64xf32>
    %36 = vector.extract_strided_slice %35 {offsets = [0, 32], sizes = [8, 32], strides = [1, 1]} : vector<8x64xf32> to vector<8x32xf32>
    %37 = arith.truncf %36 : vector<8x32xf32> to vector<8x32xbf16>
    %c0_16 = arith.constant 0 : index
    %c0_17 = arith.constant 0 : index
    %c0_18 = arith.constant 0 : index
    %38 = vector.load %arg11[%c0_16, %c0_17, %c0_18] : memref<1x8x32xbf16, #tpu.memory_space<vmem>>, vector<1x8x32xbf16>
    %39 = vector.shape_cast %38 : vector<1x8x32xbf16> to vector<8x32xbf16>
    %40 = vector.shape_cast %37 : vector<8x32xbf16> to vector<1x8x32xbf16>
    tpu.vector_store %arg11[%c0_16, %c0_17, %c0_18], %40 {strides = array<i32>} : memref<1x8x32xbf16, #tpu.memory_space<vmem>>, vector<1x8x32xbf16>,
    %c0_19 = arith.constant 0 : index
    %c0_20 = arith.constant 0 : index
    %41 = vector.load %arg7[%c0_19, %c0_20] : memref<1x32xf32, #tpu.memory_space<vmem>>, vector<1x32xf32>
    %c0_21 = arith.constant 0 : index
    %c0_22 = arith.constant 0 : index
    %42 = vector.load %arg8[%c0_21, %c0_22] : memref<1x32xf32, #tpu.memory_space<vmem>>, vector<1x32xf32>
    %43 = vector.extract_strided_slice %33 {offsets = [0, 0], sizes = [8, 16], strides = [1, 1]} : vector<8x32xf32> to vector<8x16xf32>
    %44 = vector.extract_strided_slice %35 {offsets = [0, 0], sizes = [8, 16], strides = [1, 1]} : vector<8x64xf32> to vector<8x16xf32>
    %45 = arith.mulf %43, %43 : vector<8x16xf32>
    %cst_23 = arith.constant dense<0.000000e+00> : vector<8xf32>
    %46 = vector.multi_reduction <add>, %45, %cst_23 [1] : vector<8x16xf32> to vector<8xf32>
    %47 = vector.shape_cast %46 : vector<8xf32> to vector<8x1xf32>
    %48 = math.sqrt %47 : vector<8x1xf32>
    %cst_24 = arith.constant 9.99999996E-13 : f32
    %49 = vector.broadcast %cst_24 : f32 to vector<8x1xf32>
    %50 = arith.maximumf %48, %49 : vector<8x1xf32>
    %51 = vector.broadcast %50 : vector<8x1xf32> to vector<8x16xf32>
    %52 = arith.divf %43, %51 : vector<8x16xf32>
    %53 = arith.mulf %44, %44 : vector<8x16xf32>
    %cst_25 = arith.constant dense<0.000000e+00> : vector<8xf32>
    %54 = vector.multi_reduction <add>, %53, %cst_25 [1] : vector<8x16xf32> to vector<8xf32>
    %55 = vector.shape_cast %54 : vector<8xf32> to vector<8x1xf32>
    %56 = math.sqrt %55 : vector<8x1xf32>
    %cst_26 = arith.constant 9.99999996E-13 : f32
    %57 = vector.broadcast %cst_26 : f32 to vector<8x1xf32>
    %58 = arith.maximumf %56, %57 : vector<8x1xf32>
    %59 = vector.broadcast %58 : vector<8x1xf32> to vector<8x16xf32>
    %60 = arith.divf %44, %59 : vector<8x16xf32>
    %61 = vector.extract_strided_slice %41 {offsets = [0, 0], sizes = [1, 16], strides = [1, 1]} : vector<1x32xf32> to vector<1x16xf32>
    %62 = vector.broadcast %61 : vector<1x16xf32> to vector<8x16xf32>
    %63 = arith.mulf %52, %62 : vector<8x16xf32>
    %64 = arith.truncf %63 : vector<8x16xf32> to vector<8x16xbf16>
    %c0_27 = arith.constant 0 : index
    %c0_28 = arith.constant 0 : index
    %c0_29 = arith.constant 0 : index
    %65 = vector.load %arg9[%c0_27, %c0_28, %c0_29] : memref<1x8x32xbf16, #tpu.memory_space<vmem>>, vector<1x8x16xbf16>
    %66 = vector.shape_cast %65 : vector<1x8x16xbf16> to vector<8x16xbf16>
    %67 = vector.shape_cast %64 : vector<8x16xbf16> to vector<1x8x16xbf16>
    tpu.vector_store %arg9[%c0_27, %c0_28, %c0_29], %67 {strides = array<i32>} : memref<1x8x32xbf16, #tpu.memory_space<vmem>>, vector<1x8x16xbf16>,
    %68 = vector.extract_strided_slice %42 {offsets = [0, 0], sizes = [1, 16], strides = [1, 1]} : vector<1x32xf32> to vector<1x16xf32>
    %69 = vector.broadcast %68 : vector<1x16xf32> to vector<8x16xf32>
    %70 = arith.mulf %60, %69 : vector<8x16xf32>
    %71 = arith.truncf %70 : vector<8x16xf32> to vector<8x16xbf16>
    %c0_30 = arith.constant 0 : index
    %c0_31 = arith.constant 0 : index
    %c0_32 = arith.constant 0 : index
    %72 = vector.load %arg10[%c0_30, %c0_31, %c0_32] : memref<1x8x32xbf16, #tpu.memory_space<vmem>>, vector<1x8x16xbf16>
    %73 = vector.shape_cast %72 : vector<1x8x16xbf16> to vector<8x16xbf16>
    %74 = vector.shape_cast %71 : vector<8x16xbf16> to vector<1x8x16xbf16>
    tpu.vector_store %arg10[%c0_30, %c0_31, %c0_32], %74 {strides = array<i32>} : memref<1x8x32xbf16, #tpu.memory_space<vmem>>, vector<1x8x16xbf16>,
    %75 = vector.extract_strided_slice %33 {offsets = [0, 16], sizes = [8, 16], strides = [1, 1]} : vector<8x32xf32> to vector<8x16xf32>
    %76 = vector.extract_strided_slice %35 {offsets = [0, 16], sizes = [8, 16], strides = [1, 1]} : vector<8x64xf32> to vector<8x16xf32>
    %77 = arith.mulf %75, %75 : vector<8x16xf32>
    %cst_33 = arith.constant dense<0.000000e+00> : vector<8xf32>
    %78 = vector.multi_reduction <add>, %77, %cst_33 [1] : vector<8x16xf32> to vector<8xf32>
    %79 = vector.shape_cast %78 : vector<8xf32> to vector<8x1xf32>
    %80 = math.sqrt %79 : vector<8x1xf32>
    %cst_34 = arith.constant 9.99999996E-13 : f32
    %81 = vector.broadcast %cst_34 : f32 to vector<8x1xf32>
    %82 = arith.maximumf %80, %81 : vector<8x1xf32>
    %83 = vector.broadcast %82 : vector<8x1xf32> to vector<8x16xf32>
    %84 = arith.divf %75, %83 : vector<8x16xf32>
    %85 = arith.mulf %76, %76 : vector<8x16xf32>
    %cst_35 = arith.constant dense<0.000000e+00> : vector<8xf32>
    %86 = vector.multi_reduction <add>, %85, %cst_35 [1] : vector<8x16xf32> to vector<8xf32>
    %87 = vector.shape_cast %86 : vector<8xf32> to vector<8x1xf32>
    %88 = math.sqrt %87 : vector<8x1xf32>
    %cst_36 = arith.constant 9.99999996E-13 : f32
    %89 = vector.broadcast %cst_36 : f32 to vector<8x1xf32>
    %90 = arith.maximumf %88, %89 : vector<8x1xf32>
    %91 = vector.broadcast %90 : vector<8x1xf32> to vector<8x16xf32>
    %92 = arith.divf %76, %91 : vector<8x16xf32>
    %93 = vector.extract_strided_slice %41 {offsets = [0, 16], sizes = [1, 16], strides = [1, 1]} : vector<1x32xf32> to vector<1x16xf32>
    %94 = vector.broadcast %93 : vector<1x16xf32> to vector<8x16xf32>
    %95 = arith.mulf %84, %94 : vector<8x16xf32>
    %96 = arith.truncf %95 : vector<8x16xf32> to vector<8x16xbf16>
    %c0_37 = arith.constant 0 : index
    %c0_38 = arith.constant 0 : index
    %c16 = arith.constant 16 : index
    %97 = vector.load %arg9[%c0_37, %c0_38, %c16] : memref<1x8x32xbf16, #tpu.memory_space<vmem>>, vector<1x8x16xbf16>
    %98 = vector.shape_cast %97 : vector<1x8x16xbf16> to vector<8x16xbf16>
    %99 = vector.shape_cast %96 : vector<8x16xbf16> to vector<1x8x16xbf16>
    tpu.vector_store %arg9[%c0_37, %c0_38, %c16], %99 {strides = array<i32>} : memref<1x8x32xbf16, #tpu.memory_space<vmem>>, vector<1x8x16xbf16>,
    %100 = vector.extract_strided_slice %42 {offsets = [0, 16], sizes = [1, 16], strides = [1, 1]} : vector<1x32xf32> to vector<1x16xf32>
    %101 = vector.broadcast %100 : vector<1x16xf32> to vector<8x16xf32>
    %102 = arith.mulf %92, %101 : vector<8x16xf32>
    %103 = arith.truncf %102 : vector<8x16xf32> to vector<8x16xbf16>
    %c0_39 = arith.constant 0 : index
    %c0_40 = arith.constant 0 : index
    %c16_41 = arith.constant 16 : index
    %104 = vector.load %arg10[%c0_39, %c0_40, %c16_41] : memref<1x8x32xbf16, #tpu.memory_space<vmem>>, vector<1x8x16xbf16>
    %105 = vector.shape_cast %104 : vector<1x8x16xbf16> to vector<8x16xbf16>
    %106 = vector.shape_cast %103 : vector<8x16xbf16> to vector<1x8x16xbf16>
    tpu.vector_store %arg10[%c0_39, %c0_40, %c16_41], %106 {strides = array<i32>} : memref<1x8x32xbf16, #tpu.memory_space<vmem>>, vector<1x8x16xbf16>,
    return
  }
  func.func @transform_0(%arg0: i32, %arg1: i32) -> (i32, i32, i32) {
    %c0_i32 = arith.constant 0 : i32
    %c0_i32_0 = arith.constant 0 : i32
    return %arg0, %arg1, %c0_i32 : i32, i32, i32
  }
  func.func @transform_1(%arg0: i32, %arg1: i32) -> (i32, i32) {
    %c0_i32 = arith.constant 0 : i32
    %c0_i32_0 = arith.constant 0 : i32
    %c0_i32_1 = arith.constant 0 : i32
    return %c0_i32, %c0_i32_0 : i32, i32
  }
  func.func @transform_2(%arg0: i32, %arg1: i32) -> (i32, i32) {
    %c0_i32 = arith.constant 0 : i32
    %c0_i32_0 = arith.constant 0 : i32
    %c0_i32_1 = arith.constant 0 : i32
    return %c0_i32, %c0_i32_0 : i32, i32
  }
  func.func @transform_3(%arg0: i32, %arg1: i32) -> (i32, i32) {
    %c0_i32 = arith.constant 0 : i32
    %c0_i32_0 = arith.constant 0 : i32
    %c0_i32_1 = arith.constant 0 : i32
    return %c0_i32, %c0_i32_0 : i32, i32
  }
  func.func @transform_4(%arg0: i32, %arg1: i32) -> (i32, i32) {
    %c0_i32 = arith.constant 0 : i32
    %c0_i32_0 = arith.constant 0 : i32
    %c0_i32_1 = arith.constant 0 : i32
    return %c0_i32, %c0_i32_0 : i32, i32
  }
  func.func @transform_5(%arg0: i32, %arg1: i32) -> (i32, i32) {
    %c0_i32 = arith.constant 0 : i32
    %c0_i32_0 = arith.constant 0 : i32
    %c0_i32_1 = arith.constant 0 : i32
    return %c0_i32, %c0_i32_0 : i32, i32
  }
  func.func @transform_6(%arg0: i32, %arg1: i32) -> (i32, i32) {
    %c0_i32 = arith.constant 0 : i32
    %c0_i32_0 = arith.constant 0 : i32
    %c0_i32_1 = arith.constant 0 : i32
    return %c0_i32, %c0_i32_0 : i32, i32
  }
  func.func @transform_7(%arg0: i32, %arg1: i32) -> (i32, i32, i32) {
    %c0_i32 = arith.constant 0 : i32
    %c0_i32_0 = arith.constant 0 : i32
    return %arg0, %arg1, %c0_i32 : i32, i32, i32
  }
  func.func @transform_8(%arg0: i32, %arg1: i32) -> (i32, i32, i32) {
    %c0_i32 = arith.constant 0 : i32
    %c0_i32_0 = arith.constant 0 : i32
    return %arg0, %arg1, %c0_i32 : i32, i32, i32
  }
  func.func @transform_9(%arg0: i32, %arg1: i32) -> (i32, i32, i32) {
    %c0_i32 = arith.constant 0 : i32
    %c0_i32_0 = arith.constant 0 : i32
    return %arg0, %arg1, %c0_i32 : i32, i32, i32
  }
}

module attributes {stable_mosaic.version = 11 : i64} {
  func.func @_proj_kernel(%arg0: i32, %arg1: i32, %arg2: memref<1x8x32xbf16, #tpu.memory_space<vmem>>, %arg3: memref<1x32xf32, #tpu.memory_space<vmem>>, %arg4: memref<1x32xf32, #tpu.memory_space<vmem>>, %arg5: memref<32x32xbf16, #tpu.memory_space<vmem>>, %arg6: memref<32x64xbf16, #tpu.memory_space<vmem>>, %arg7: memref<1x32xf32, #tpu.memory_space<vmem>>, %arg8: memref<1x32xf32, #tpu.memory_space<vmem>>, %arg9: memref<1x8x32xbf16, #tpu.memory_space<vmem>>, %arg10: memref<1x8x32xbf16, #tpu.memory_space<vmem>>, %arg11: memref<1x8x32xbf16, #tpu.memory_space<vmem>>) attributes {dimension_semantics = [#tpu.dimension_semantics<parallel>, #tpu.dimension_semantics<parallel>], iteration_bounds = array<i64: 2, 1>, scalar_prefetch = 0 : i64, scratch_operands = 0 : i64, tpu.core_type = #tpu.core_type<tc>, window_params = [{transform_indices = @transform_0, window_bounds = array<i64: 1, 8, 32>}, {pipeline_mode = #tpu.pipeline_mode<synchronous>, transform_indices = @transform_1, window_bounds = array<i64: 1, 32>}, {pipeline_mode = #tpu.pipeline_mode<synchronous>, transform_indices = @transform_2, window_bounds = array<i64: 1, 32>}, {pipeline_mode = #tpu.pipeline_mode<synchronous>, transform_indices = @transform_3, window_bounds = array<i64: 32, 32>}, {pipeline_mode = #tpu.pipeline_mode<synchronous>, transform_indices = @transform_4, window_bounds = array<i64: 32, 64>}, {pipeline_mode = #tpu.pipeline_mode<synchronous>, transform_indices = @transform_5, window_bounds = array<i64: 1, 32>}, {pipeline_mode = #tpu.pipeline_mode<synchronous>, transform_indices = @transform_6, window_bounds = array<i64: 1, 32>}, {transform_indices = @transform_7, window_bounds = array<i64: 1, 8, 32>}, {transform_indices = @transform_8, window_bounds = array<i64: 1, 8, 32>}, {transform_indices = @transform_9, window_bounds = array<i64: 1, 8, 32>}]} {
    %c0 = arith.constant 0 : index
    %c0_0 = arith.constant 0 : index
    %c0_1 = arith.constant 0 : index
    %0 = vector.load %arg2[%c0, %c0_0, %c0_1] : memref<1x8x32xbf16, #tpu.memory_space<vmem>>, vector<1x8x32xbf16>
    %1 = vector.shape_cast %0 : vector<1x8x32xbf16> to vector<8x32xbf16>
    %2 = arith.extf %1 : vector<8x32xbf16> to vector<8x32xf32>
    %cst = arith.constant dense<0.000000e+00> : vector<8xf32>
    %3 = vector.multi_reduction <add>, %2, %cst [1] : vector<8x32xf32> to vector<8xf32>
    %4 = vector.shape_cast %3 : vector<8xf32> to vector<8x1xf32>
    %cst_2 = arith.constant 3.200000e+01 : f32
    %5 = vector.broadcast %cst_2 : f32 to vector<8x1xf32>
    %6 = arith.divf %4, %5 : vector<8x1xf32>
    %7 = vector.broadcast %6 : vector<8x1xf32> to vector<8x32xf32>
    %8 = arith.subf %2, %7 : vector<8x32xf32>
    %9 = arith.mulf %8, %8 : vector<8x32xf32>
    %cst_3 = arith.constant dense<0.000000e+00> : vector<8xf32>
    %10 = vector.multi_reduction <add>, %9, %cst_3 [1] : vector<8x32xf32> to vector<8xf32>
    %11 = vector.shape_cast %10 : vector<8xf32> to vector<8x1xf32>
    %cst_4 = arith.constant 3.200000e+01 : f32
    %12 = vector.broadcast %cst_4 : f32 to vector<8x1xf32>
    %13 = arith.divf %11, %12 : vector<8x1xf32>
    %14 = vector.broadcast %6 : vector<8x1xf32> to vector<8x32xf32>
    %15 = arith.subf %2, %14 : vector<8x32xf32>
    %cst_5 = arith.constant 9.99999974E-6 : f32
    %16 = vector.broadcast %cst_5 : f32 to vector<8x1xf32>
    %17 = arith.addf %13, %16 : vector<8x1xf32>
    %18 = math.rsqrt %17 : vector<8x1xf32>
    %19 = vector.broadcast %18 : vector<8x1xf32> to vector<8x32xf32>
    %20 = arith.mulf %15, %19 : vector<8x32xf32>
    %c0_6 = arith.constant 0 : index
    %c0_7 = arith.constant 0 : index
    %21 = vector.load %arg3[%c0_6, %c0_7] : memref<1x32xf32, #tpu.memory_space<vmem>>, vector<1x32xf32>
    %22 = vector.shape_cast %21 : vector<1x32xf32> to vector<32xf32>
    %23 = vector.shape_cast %22 : vector<32xf32> to vector<1x32xf32>
    %24 = vector.broadcast %23 : vector<1x32xf32> to vector<8x32xf32>
    %25 = arith.mulf %20, %24 : vector<8x32xf32>
    %c0_8 = arith.constant 0 : index
    %c0_9 = arith.constant 0 : index
    %26 = vector.load %arg4[%c0_8, %c0_9] : memref<1x32xf32, #tpu.memory_space<vmem>>, vector<1x32xf32>
    %27 = vector.shape_cast %26 : vector<1x32xf32> to vector<32xf32>
    %28 = vector.shape_cast %27 : vector<32xf32> to vector<1x32xf32>
    %29 = vector.broadcast %28 : vector<1x32xf32> to vector<8x32xf32>
    %30 = arith.addf %25, %29 : vector<8x32xf32>
    %31 = arith.truncf %30 : vector<8x32xf32> to vector<8x32xbf16>
    %c0_10 = arith.constant 0 : index
    %c0_11 = arith.constant 0 : index
    %32 = vector.load %arg5[%c0_10, %c0_11] : memref<32x32xbf16, #tpu.memory_space<vmem>>, vector<32x32xbf16>
    %cst_12 = arith.constant dense<0.000000e+00> : vector<8x32xf32>
    %33 = tpu.matmul %31, %32, %cst_12 {dimension_numbers = #tpu.dot_dimension_numbers<[1], [0], [0], [1], [0, 0, 1, 1], [], []>} : vector<8x32xbf16>, vector<32x32xbf16>, vector<8x32xf32> -> vector<8x32xf32>
    %c0_13 = arith.constant 0 : index
    %c0_14 = arith.constant 0 : index
    %34 = vector.load %arg6[%c0_13, %c0_14] : memref<32x64xbf16, #tpu.memory_space<vmem>>, vector<32x64xbf16>
    %cst_15 = arith.constant dense<0.000000e+00> : vector<8x64xf32>
    %35 = tpu.matmul %31, %34, %cst_15 {dimension_numbers = #tpu.dot_dimension_numbers<[1], [0], [0], [1], [0, 0, 1, 1], [], []>} : vector<8x32xbf16>, vector<32x64xbf16>, vector<8x64xf32> -> vector<8x64xf32>
    %36 = vector.extract_strided_slice %35 {offsets = [0, 32], sizes = [8, 32], strides = [1, 1]} : vector<8x64xf32> to vector<8x32xf32>
    %37 = arith.truncf %36 : vector<8x32xf32> to vector<8x32xbf16>
    %c0_16 = arith.constant 0 : index
    %c0_17 = arith.constant 0 : index
    %c0_18 = arith.constant 0 : index
    %38 = vector.load %arg11[%c0_16, %c0_17, %c0_18] : memref<1x8x32xbf16, #tpu.memory_space<vmem>>, vector<1x8x32xbf16>
    %39 = vector.shape_cast %38 : vector<1x8x32xbf16> to vector<8x32xbf16>
    %40 = vector.shape_cast %37 : vector<8x32xbf16> to vector<1x8x32xbf16>
    tpu.vector_store %arg11[%c0_16, %c0_17, %c0_18], %40 {strides = array<i32>} : memref<1x8x32xbf16, #tpu.memory_space<vmem>>, vector<1x8x32xbf16>,
    %c0_19 = arith.constant 0 : index
    %c0_20 = arith.constant 0 : index
    %41 = vector.load %arg7[%c0_19, %c0_20] : memref<1x32xf32, #tpu.memory_space<vmem>>, vector<1x32xf32>
    %c0_21 = arith.constant 0 : index
    %c0_22 = arith.constant 0 : index
    %42 = vector.load %arg8[%c0_21, %c0_22] : memref<1x32xf32, #tpu.memory_space<vmem>>, vector<1x32xf32>
    %43 = vector.extract_strided_slice %33 {offsets = [0, 0], sizes = [8, 16], strides = [1, 1]} : vector<8x32xf32> to vector<8x16xf32>
    %44 = vector.extract_strided_slice %35 {offsets = [0, 0], sizes = [8, 16], strides = [1, 1]} : vector<8x64xf32> to vector<8x16xf32>
    %45 = arith.mulf %43, %43 : vector<8x16xf32>
    %cst_23 = arith.constant dense<0.000000e+00> : vector<8xf32>
    %46 = vector.multi_reduction <add>, %45, %cst_23 [1] : vector<8x16xf32> to vector<8xf32>
    %47 = vector.shape_cast %46 : vector<8xf32> to vector<8x1xf32>
    %48 = math.sqrt %47 : vector<8x1xf32>
    %cst_24 = arith.constant 9.99999996E-13 : f32
    %49 = vector.broadcast %cst_24 : f32 to vector<8x1xf32>
    %50 = arith.maximumf %48, %49 : vector<8x1xf32>
    %51 = vector.broadcast %50 : vector<8x1xf32> to vector<8x16xf32>
    %52 = arith.divf %43, %51 : vector<8x16xf32>
    %53 = arith.mulf %44, %44 : vector<8x16xf32>
    %cst_25 = arith.constant dense<0.000000e+00> : vector<8xf32>
    %54 = vector.multi_reduction <add>, %53, %cst_25 [1] : vector<8x16xf32> to vector<8xf32>
    %55 = vector.shape_cast %54 : vector<8xf32> to vector<8x1xf32>
    %56 = math.sqrt %55 : vector<8x1xf32>
    %cst_26 = arith.constant 9.99999996E-13 : f32
    %57 = vector.broadcast %cst_26 : f32 to vector<8x1xf32>
    %58 = arith.maximumf %56, %57 : vector<8x1xf32>
    %59 = vector.broadcast %58 : vector<8x1xf32> to vector<8x16xf32>
    %60 = arith.divf %44, %59 : vector<8x16xf32>
    %61 = vector.extract_strided_slice %41 {offsets = [0, 0], sizes = [1, 16], strides = [1, 1]} : vector<1x32xf32> to vector<1x16xf32>
    %62 = vector.broadcast %61 : vector<1x16xf32> to vector<8x16xf32>
    %63 = arith.mulf %52, %62 : vector<8x16xf32>
    %64 = arith.truncf %63 : vector<8x16xf32> to vector<8x16xbf16>
    %c0_27 = arith.constant 0 : index
    %c0_28 = arith.constant 0 : index
    %c0_29 = arith.constant 0 : index
    %65 = vector.load %arg9[%c0_27, %c0_28, %c0_29] : memref<1x8x32xbf16, #tpu.memory_space<vmem>>, vector<1x8x16xbf16>
    %66 = vector.shape_cast %65 : vector<1x8x16xbf16> to vector<8x16xbf16>
    %67 = vector.shape_cast %64 : vector<8x16xbf16> to vector<1x8x16xbf16>
    tpu.vector_store %arg9[%c0_27, %c0_28, %c0_29], %67 {strides = array<i32>} : memref<1x8x32xbf16, #tpu.memory_space<vmem>>, vector<1x8x16xbf16>,
    %68 = vector.extract_strided_slice %42 {offsets = [0, 0], sizes = [1, 16], strides = [1, 1]} : vector<1x32xf32> to vector<1x16xf32>
    %69 = vector.broadcast %68 : vector<1x16xf32> to vector<8x16xf32>
    %70 = arith.mulf %60, %69 : vector<8x16xf32>
    %71 = arith.truncf %70 : vector<8x16xf32> to vector<8x16xbf16>
    %c0_30 = arith.constant 0 : index
    %c0_31 = arith.constant 0 : index
    %c0_32 = arith.constant 0 : index
    %72 = vector.load %arg10[%c0_30, %c0_31, %c0_32] : memref<1x8x32xbf16, #tpu.memory_space<vmem>>, vector<1x8x16xbf16>
    %73 = vector.shape_cast %72 : vector<1x8x16xbf16> to vector<8x16xbf16>
    %74 = vector.shape_cast %71 : vector<8x16xbf16> to vector<1x8x16xbf16>
    tpu.vector_store %arg10[%c0_30, %c0_31, %c0_32], %74 {strides = array<i32>} : memref<1x8x32xbf16, #tpu.memory_space<vmem>>, vector<1x8x16xbf16>,
    %75 = vector.extract_strided_slice %33 {offsets = [0, 16], sizes = [8, 16], strides = [1, 1]} : vector<8x32xf32> to vector<8x16xf32>
    %76 = vector.extract_strided_slice %35 {offsets = [0, 16], sizes = [8, 16], strides = [1, 1]} : vector<8x64xf32> to vector<8x16xf32>
    %77 = arith.mulf %75, %75 : vector<8x16xf32>
    %cst_33 = arith.constant dense<0.000000e+00> : vector<8xf32>
    %78 = vector.multi_reduction <add>, %77, %cst_33 [1] : vector<8x16xf32> to vector<8xf32>
    %79 = vector.shape_cast %78 : vector<8xf32> to vector<8x1xf32>
    %80 = math.sqrt %79 : vector<8x1xf32>
    %cst_34 = arith.constant 9.99999996E-13 : f32
    %81 = vector.broadcast %cst_34 : f32 to vector<8x1xf32>
    %82 = arith.maximumf %80, %81 : vector<8x1xf32>
    %83 = vector.broadcast %82 : vector<8x1xf32> to vector<8x16xf32>
    %84 = arith.divf %75, %83 : vector<8x16xf32>
    %85 = arith.mulf %76, %76 : vector<8x16xf32>
    %cst_35 = arith.constant dense<0.000000e+00> : vector<8xf32>
    %86 = vector.multi_reduction <add>, %85, %cst_35 [1] : vector<8x16xf32> to vector<8xf32>
    %87 = vector.shape_cast %86 : vector<8xf32> to vector<8x1xf32>
    %88 = math.sqrt %87 : vector<8x1xf32>
    %cst_36 = arith.constant 9.99999996E-13 : f32
    %89 = vector.broadcast %cst_36 : f32 to vector<8x1xf32>
    %90 = arith.maximumf %88, %89 : vector<8x1xf32>
    %91 = vector.broadcast %90 : vector<8x1xf32> to vector<8x16xf32>
    %92 = arith.divf %76, %91 : vector<8x16xf32>
    %93 = vector.extract_strided_slice %41 {offsets = [0, 16], sizes = [1, 16], strides = [1, 1]} : vector<1x32xf32> to vector<1x16xf32>
    %94 = vector.broadcast %93 : vector<1x16xf32> to vector<8x16xf32>
    %95 = arith.mulf %84, %94 : vector<8x16xf32>
    %96 = arith.truncf %95 : vector<8x16xf32> to vector<8x16xbf16>
    %c0_37 = arith.constant 0 : index
    %c0_38 = arith.constant 0 : index
    %c16 = arith.constant 16 : index
    %97 = vector.load %arg9[%c0_37, %c0_38, %c16] : memref<1x8x32xbf16, #tpu.memory_space<vmem>>, vector<1x8x16xbf16>
    %98 = vector.shape_cast %97 : vector<1x8x16xbf16> to vector<8x16xbf16>
    %99 = vector.shape_cast %96 : vector<8x16xbf16> to vector<1x8x16xbf16>
    tpu.vector_store %arg9[%c0_37, %c0_38, %c16], %99 {strides = array<i32>} : memref<1x8x32xbf16, #tpu.memory_space<vmem>>, vector<1x8x16xbf16>,
    %100 = vector.extract_strided_slice %42 {offsets = [0, 16], sizes = [1, 16], strides = [1, 1]} : vector<1x32xf32> to vector<1x16xf32>
    %101 = vector.broadcast %100 : vector<1x16xf32> to vector<8x16xf32>
    %102 = arith.mulf %92, %101 : vector<8x16xf32>
    %103 = arith.truncf %102 : vector<8x16xf32> to vector<8x16xbf16>
    %c0_39 = arith.constant 0 : index
    %c0_40 = arith.constant 0 : index
    %c16_41 = arith.constant 16 : index
    %104 = vector.load %arg10[%c0_39, %c0_40, %c16_41] : memref<1x8x32xbf16, #tpu.memory_space<vmem>>, vector<1x8x16xbf16>
    %105 = vector.shape_cast %104 : vector<1x8x16xbf16> to vector<8x16xbf16>
    %106 = vector.shape_cast %103 : vector<8x16xbf16> to vector<1x8x16xbf16>
    tpu.vector_store %arg10[%c0_39, %c0_40, %c16_41], %106 {strides = array<i32>} : memref<1x8x32xbf16, #tpu.memory_space<vmem>>, vector<1x8x16xbf16>,
    return
  }
  func.func @transform_0(%arg0: i32, %arg1: i32) -> (i32, i32, i32) {
    %c0_i32 = arith.constant 0 : i32
    %c0_i32_0 = arith.constant 0 : i32
    return %arg0, %arg1, %c0_i32 : i32, i32, i32
  }
  func.func @transform_1(%arg0: i32, %arg1: i32) -> (i32, i32) {
    %c0_i32 = arith.constant 0 : i32
    %c0_i32_0 = arith.constant 0 : i32
    %c0_i32_1 = arith.constant 0 : i32
    return %c0_i32, %c0_i32_0 : i32, i32
  }
  func.func @transform_2(%arg0: i32, %arg1: i32) -> (i32, i32) {
    %c0_i32 = arith.constant 0 : i32
    %c0_i32_0 = arith.constant 0 : i32
    %c0_i32_1 = arith.constant 0 : i32
    return %c0_i32, %c0_i32_0 : i32, i32
  }
  func.func @transform_3(%arg0: i32, %arg1: i32) -> (i32, i32) {
    %c0_i32 = arith.constant 0 : i32
    %c0_i32_0 = arith.constant 0 : i32
    %c0_i32_1 = arith.constant 0 : i32
    return %c0_i32, %c0_i32_0 : i32, i32
  }
  func.func @transform_4(%arg0: i32, %arg1: i32) -> (i32, i32) {
    %c0_i32 = arith.constant 0 : i32
    %c0_i32_0 = arith.constant 0 : i32
    %c0_i32_1 = arith.constant 0 : i32
    return %c0_i32, %c0_i32_0 : i32, i32
  }
  func.func @transform_5(%arg0: i32, %arg1: i32) -> (i32, i32) {
    %c0_i32 = arith.constant 0 : i32
    %c0_i32_0 = arith.constant 0 : i32
    %c0_i32_1 = arith.constant 0 : i32
    return %c0_i32, %c0_i32_0 : i32, i32
  }
  func.func @transform_6(%arg0: i32, %arg1: i32) -> (i32, i32) {
    %c0_i32 = arith.constant 0 : i32
    %c0_i32_0 = arith.constant 0 : i32
    %c0_i32_1 = arith.constant 0 : i32
    return %c0_i32, %c0_i32_0 : i32, i32
  }
  func.func @transform_7(%arg0: i32, %arg1: i32) -> (i32, i32, i32) {
    %c0_i32 = arith.constant 0 : i32
    %c0_i32_0 = arith.constant 0 : i32
    return %arg0, %arg1, %c0_i32 : i32, i32, i32
  }
  func.func @transform_8(%arg0: i32, %arg1: i32) -> (i32, i32, i32) {
    %c0_i32 = arith.constant 0 : i32
    %c0_i32_0 = arith.constant 0 : i32
    return %arg0, %arg1, %c0_i32 : i32, i32, i32
  }
  func.func @transform_9(%arg0: i32, %arg1: i32) -> (i32, i32, i32) {
    %c0_i32 = arith.constant 0 : i32
    %c0_i32_0 = arith.constant 0 : i32
    return %arg0, %arg1, %c0_i32 : i32, i32, i32
  }
}

</mosaic_0001>

<bundles_post_ra>
// kernel: tpu_custom_call.1
= control target key start
LH: loop header
LB: loop body
LE: loop exit
PB: predicated region body
PF: predicated region fallthrough
CT: control target
= control target key end

     0   :  { %s1720_s0 = inlined_call_operand.hbm [shape: bf16[2,8,32], index: 0, kind: input, shape index: {}]   ;;  %s1721_s1 = inlined_call_operand.vmem [shape: f32[1,32], index: 1, kind: input, shape index: {}]   ;;  %s1722_s2 = inlined_call_operand.vmem [shape: f32[1,32], index: 2, kind: input, shape index: {}]   ;;  %s1723_s3 = inlined_call_operand.hbm [shape: bf16[32,32], index: 3, kind: input, shape index: {}]   ;;  %s1724_s4 = inlined_call_operand.hbm [shape: bf16[32,64], index: 4, kind: input, shape index: {}]   ;;  %s1725_s5 = inlined_call_operand.vmem [shape: f32[1,32], index: 5, kind: input, shape index: {}]   ;;  %s1726_s6 = inlined_call_operand.vmem [shape: f32[1,32], index: 6, kind: input, shape index: {}]   ;;  %s1727_s7 = inlined_call_operand.hbm [shape: bf16[2,8,32], index: 7, kind: output, shape index: {0}]   ;;  %s1728_s8 = inlined_call_operand.hbm [shape: bf16[2,8,32], index: 8, kind: output, shape index: {1}]   ;;  %s1729_s9 = inlined_call_operand.hbm [shape: bf16[2,8,32], index: 9, kind: output, shape index: {2}]  }
   0x1   :  { %1737 = sst [smem:[#allocation18_spill]] %s1720_s0 }
   0x2   :  { %1738 = sst [smem:[#allocation19_spill]] %s1721_s1 }
   0x3   :  { %1739 = sst [smem:[#allocation20_spill]] %s1722_s2 }
   0x4   :  { %1740 = sst [smem:[#allocation21_spill]] %s1723_s3 }
   0x5   :  { %1741 = sst [smem:[#allocation22_spill]] %s1727_s7 }
   0x6   :  { %15 = vsyncpa [#allocation3], 0 }
   0x7   :  { %17 = vsyncpa [#allocation3 + $0x1], 0 }
   0x8   :  { %18 = vsyncpa [#allocation6], 0 }
   0x9   :  { %19 = vsyncpa [#allocation4], 0 }
   0xa   :  { %21 = vsyncpa [#allocation4 + $0x1], 0 }
   0xb   :  { %22 = vsyncpa [#allocation10], 0 }
   0xc   :  { %24 = vsyncpa [#allocation10 + $0x1], 0  ;;  %s1355_s30 = smov 0   ;;  %s1357_s10 = smov 0  }
   0xd   :  { %s1359_s11 = smov 0   ;;  %s1361_s12 = smov 0  }
   0xe   :  { %s1363_s13 = smov 0   ;;  %s1365_s14 = smov 0  }
   0xf LB: > { %1742 = sst [smem:[#allocation16_spill]] %s1271_s30  ;;  %s1386_s15 = sadd.s32 4294967295, %s1291_s14   ;;  %s1291_s14 = sphi %s1365_s14, %s30_s14   ;;  %s1287_s13 = sphi %s1363_s13, %s1769_s13   ;;  %s1283_s12 = sphi %s1361_s12, %s1768_s12   ;;  %s1279_s11 = sphi %s1359_s11, %s1767_s11   ;;  %s1275_s10 = sphi %s1357_s10, %s1766_s10   ;;  %s1271_s30 = sphi %s1355_s30, %s1765_s30  }
  0x10   : > { %s1730_s16 = sadd.s32 4294967294, %s1291_s14   ;;  %p64_p0 = scmp.ne.s32.totalorder %s1275_s10, %s1271_s30 }
  0x11   : > { %p1731_p1 = scmp.eq.s32.totalorder %s1386_s15, 0  ;;  %p222_p3 = scmp.eq.s32.totalorder %s1730_s16, 1 }
  0x12   : > { %p883_p5 = scmp.ge.s32.totalorder %s1291_s14, 1  ;;  %p285_p7 = scmp.lt.s32.totalorder %s1291_s14, 3 }
  0x13   : > { %p1397_p4 = por %p1731_p1, %p64_p0  ;;  %p1402_p6 = por %p222_p3, %p64_p0 }
  0x14   : > { %p1407_p8 = pnand %p883_p5, %p285_p7  ;;  %s1293_s20 = smov [#allocation5]  }
  0x15   : > { %s1743_s17 = scalar_select %p1397_p4, 1, 0 }
  0x16   : > { %s1744_s18 = scalar_select %p1402_p6, 1, 0 }
  0x17   : > { %s303_s21 = sshll.u32 %s1293_s20, 4  ;;  %p954_p9 = pneg %p1407_p8  ;;  %s1411_s21 = int_to_ptr.vmem [resolvable:$true] %s303_s21 }
  0x18   : > { %1745 = sst [smem:[#allocation17_spill]] %s1744_s18  ;;  %s1294_s23 = smov [#allocation7]  }
  0x19   : > { %p1418_p11 = pnand %p954_p9, %p1731_p1  ;;  %s316_s24 = sshll.u32 %s1294_s23, 4  ;;  %s1422_s24 = int_to_ptr.vmem [resolvable:$true] %s316_s24 }
  0x1a   : > { %s1748_s3 = sld [smem:[#allocation21_spill]] }
  0x1b   : > { %p1061_p13 = pneg %p1418_p11 }
  0x20   : > { %s1059_s27 = scalar_lea.hbm %s1748_s3, 256 }
  0x21   : > { %p1060_p12 = scmp.ne.s32.totalorder %s1748_s3, %s1059_s27  ;;  %p1066_p5 = scmp.lt.u32.totalorder %s1059_s27, %s1748_s3 }
  0x23   : > { %p1062_p0 = pnand %p1061_p13, %p1060_p12 }
  0x25   : > { %p1063_p3 = pneg %p1062_p0 }
  0x27   : > { %p1068_p7 = pnand %p1066_p5, %p1063_p3 }
  0x29   : > { %1071 = shalt.err (!%p1068_p7)
}
  0x2a   : > { %s1072_s23 = scalar_lea.vmem %s1411_s21, 256  ;;  %p1080_p2 = scmp.lt.s32.totalorder %s1411_s21, %s1411_s21 }
  0x2b   : > { %p1073_p9 = scmp.ne.s32.totalorder %s1411_s21, %s1072_s23  ;;  %p1081_p12 = scmp.lt.s32.totalorder %s1072_s23, %s1072_s23 }
  0x2d   : > { %p1075_p10 = pnand %p1073_p9, %p1061_p13  ;;  %p1082_p0 = por %p1081_p12, %p1080_p2 }
  0x2f   : > { %p1076_p1 = pneg %p1075_p10 }
  0x31   : > { %p1083_p6 = pnand %p1082_p0, %p1076_p1 }
  0x33   : > { %1086 = shalt.err (!%p1083_p6)
}
  0x34   : > { %s1295_s16 = smov 64   ;;  %s1296_s25 = smov 4  }
  0x35   : > { %957 = dma.hbm_to_vmem [thread:$0]  (!%p1418_p11), %s1748_s3, 256, %s1411_s21, [#allocation6], %s1295_s16, %s1295_s16, %s1296_s25  }
  0x36   : > { %s1087_s20 = scalar_lea.hbm %s1724_s4, 256 }
  0x37   : > { %p1088_p2 = scmp.ne.s32.totalorder %s1724_s4, %s1087_s20  ;;  %p1094_p10 = scmp.lt.u32.totalorder %s1087_s20, %s1724_s4 }
  0x39   : > { %p1090_p1 = pnand %p1088_p2, %p1061_p13 }
  0x3b   : > { %p1091_p6 = pneg %p1090_p1 }
  0x3d   : > { %p1096_p3 = pnand %p1094_p10, %p1091_p6 }
  0x3f   : > { %1099 = shalt.err (!%p1096_p3)
}
  0x40   : > { %s1100_s21 = scalar_lea.vmem %s1422_s24, 256  ;;  %p1108_p12 = scmp.lt.s32.totalorder %s1422_s24, %s1422_s24 }
  0x41   : > { %p1101_p5 = scmp.ne.s32.totalorder %s1422_s24, %s1100_s21  ;;  %p1109_p0 = scmp.lt.s32.totalorder %s1100_s21, %s1100_s21 }
  0x43   : > { %p1103_p7 = pnand %p1101_p5, %p1061_p13  ;;  %p1110_p2 = por %p1109_p0, %p1108_p12 }
  0x45   : > { %p1104_p9 = pneg %p1103_p7 }
  0x47   : > { %p1111_p1 = pnand %p1110_p2, %p1104_p9 }
  0x49   : > { %1114 = shalt.err (!%p1111_p1)
}
  0x4a   : > { %960 = dma.hbm_to_vmem [thread:$0]  (!%p1418_p11), %s1724_s4, 256, %s1422_s24, [#allocation6], %s1295_s16, %s1295_s16, %s1296_s25  }
  0x4b   : > { %s42_s18 = sadd.s32 1, %s1287_s13  ;;  %s51_s26 = sadd.s32 1, %s1279_s11 }
  0x4c   : > { %p44_p13 = scmp.ge.s32.totalorder %s42_s18, 2  ;;  %p58_p6 = scmp.ne.s32.totalorder %s1279_s11, %s1275_s10 }
  0x4d   : > { %p59_p10 = scmp.eq.s32.totalorder %s1291_s14, 0  ;;  %p977_p3 = scmp.lt.s32.totalorder %s1291_s14, 2 }
  0x4e   : > { %s1771_s18 = smov (%p44_p13, %s42_s18), 0  ;;  %p1749_p7 = scmp.eq.s32.totalorder %s1386_s15, 1 }
  0x4f   : > { %p60_p5 = por %p59_p10, %p58_p6  ;;  %s46_s27 = ssub.s32 %s1287_s13, %s1771_s18 }
  0x50   : > { %p1486_p9 = por %p1749_p7, %p58_p6  ;;  %s336_s28 = sand.u32 1, %s1279_s11  }
  0x51   : > { %p49_p12 = scmp.eq.s32.totalorder %s46_s27, 0  ;;  %s887_s24 = sshll.u32 %s336_s28, 2 }
  0x52   : > { %s1750_s22 = scalar_select %p1486_p9, 1, 0 }
  0x53   : > { %s888_s16 = sshll.u32 %s1287_s13, 6  ;;  %s1751_s0 = sld [smem:[#allocation18_spill]] }
  0x54   : > { %s1495_s25 = scalar_select %p49_p12, %s1279_s11, %s51_s26  }
  0x55   : > { %s340_s21 = scalar_lea.vmem [#allocation2], %s887_s24  ;;  %p1504_p11 = pnand %p977_p3, %p60_p5 }
  0x56   : > { %s348_s7 = sshll.u32 %s340_s21, 4  ;;  %s337_s26 = scalar_lea.sflag [#allocation3], %s336_s28  ;;  %s1508_s7 = int_to_ptr.vmem [resolvable:$true] %s348_s7 }
  0x57   : > { %p1117_p2 = pneg %p1504_p11 }
  0x59   : > { %s1500_s23 = scalar_lea.hbm %s1751_s0, %s888_s16  ;;  %s1120_s29 = scalar_lea.hbm %s1751_s0, 128 }
  0x5a   : > { %s1115_s27 = scalar_lea.hbm %s1500_s23, 64  ;;  %p1121_p6 = scmp.lt.u32.totalorder %s1500_s23, %s1751_s0 }
  0x5b   : > { %p1116_p0 = scmp.ne.s32.totalorder %s1500_s23, %s1115_s27  ;;  %p1122_p10 = scmp.lt.u32.totalorder %s1120_s29, %s1115_s27 }
  0x5c   : > { %p1124_p5 = scmp.lt.u32.totalorder %s1115_s27, %s1500_s23 }
  0x5d   : > { %p1118_p1 = pnand %p1117_p2, %p1116_p0  ;;  %p1123_p3 = por %p1122_p10, %p1121_p6 }
  0x5f   : > { %p1119_p13 = pneg %p1118_p1  ;;  %p1125_p7 = por %p1124_p5, %p1123_p3 }
  0x61   : > { %p1126_p12 = pnand %p1125_p7, %p1119_p13 }
  0x63   : > { %1129 = shalt.err (!%p1126_p12)
}
  0x64   : > { %s1130_s28 = scalar_lea.vmem %s1508_s7, 64  ;;  %s1297_s24 = smov [#allocation2]  }
  0x65   : > { %p1131_p0 = scmp.ne.s32.totalorder %s1508_s7, %s1130_s28  ;;  %s1135_s16 = sshll.u32 %s1297_s24, 4  ;;  %s1136_s16 = int_to_ptr.vmem [resolvable:$false] %s1135_s16 }
  0x66   : > { %s1137_s20 = scalar_lea.vmem %s1136_s16, 128  ;;  %p1138_p4 = scmp.lt.s32.totalorder %s1508_s7, %s1136_s16 }
  0x67   : > { %p1133_p1 = pnand %p1131_p0, %p1117_p2  ;;  %p1139_p6 = scmp.lt.s32.totalorder %s1137_s20, %s1130_s28 }
  0x69   : > { %p1134_p9 = pneg %p1133_p1  ;;  %p1140_p10 = por %p1139_p6, %p1138_p4 }
  0x6b   : > { %p1141_p3 = pnand %p1140_p10, %p1134_p9 }
  0x6d   : > { %1144 = shalt.err (!%p1141_p3)
}
  0x6e   : > { %964 = dma.hbm_to_vmem [thread:$0]  (!%p1504_p11), %s1500_s23, 64, %s1508_s7, %s337_s26  }
  0x6f   : > { %357 = sbr.rel (%p1407_p8) target bundleno = 1005 (0x3ed), region = 48  ;;  %s1538_s27 = sand.u32 (!%p1407_p8), 1, %s1275_s10  }
  0x70   : > { %s1541_s29 = sshll.u32 (!%p1407_p8), %s1538_s27, 2  ;;  %s360_s21 = scalar_lea.sflag (!%p1407_p8), [#allocation3], %s1538_s27 }
  0x71   : > { %s363_s28 = scalar_lea.vmem (!%p1407_p8), [#allocation2], %s1541_s29  ;;  %p1753_p4 = scmp.ne.s32.totalorder (!%p1407_p8), %s1743_s17, 0 }
  0x76   : > { %1254 = dma.done.wait (%p1753_p4), %s360_s21, 64  }
  0x77   : > { %1256 = vsyncadd (%p1753_p4), %s360_s21, 4294967232  ;;  %p1754_p9 = scmp.eq.s32.totalorder %s1386_s15, 0 }
  0x79   : > { %1258 = dma.done.wait (%p1754_p9), [#allocation6], 512   ;;  %p1755_p8 = pmov %p1754_p9 }
  0x7a   : > { %vm419_vm0 = vcmask 261120   ;;  %v417_v0 = vld [vmem:[%s363_s28] sm:$0xf]  ;;  %v1037_v8 = vld [vmem:[#allocation5] sm:$0xff]   ;;  %v1038_v9 = vld [vmem:[#allocation7] sm:$0xff]   ;;  %v1298_v10 = vmov 0.0  }
  0x7b   : > { %1260 = vsyncadd (%p1755_p8), [#allocation6], 4294966784  ;;  %v418_v1 = vunpack.c.l.bf16 %v417_v0  ;;  %922 = vmatprep.subr.bf16.mxu0 %v1298_v10  ;;  %930 = vmatprep.subr.bf16.mxu1 %v1298_v10  ;;  %v1039_v11 = vld [vmem:[#allocation5 + $0x8] sm:$0xff]   ;;  %v1040_v12 = vld [vmem:[#allocation7 + $0x8] sm:$0xff]   ;;  %vm1299_vm1 = vmmov 0   ;;  %s1756_s1 = sld [smem:[#allocation19_spill]] }
  0x7c   : > { %923 = vmatpush3.bf16.msra.mxu0 %v1037_v8  ;;  %931 = vmatpush3.bf16.msra.mxu1 %v1038_v9  ;;  %s1757_s2 = sld [smem:[#allocation20_spill]]  ;;  %vm578_vm2 = vcmask 130048   ;;  %s1300_s30 = smov 112   ;;  %v906_v48 = vld [vmem:[%s1726_s6] ss:$0 sm:$0xff]  ;;  %vm614_vm5 = vcmask 125952  }
  0x7d   : > { %v420_v2 = vsel %vm419_vm0, %v418_v1, 0.0  ;;  %924 = vmatprep.subr.bf16.mxu0 %v1298_v10  ;;  %932 = vmatprep.subr.bf16.mxu1 %v1298_v10  ;;  %s1301_s26 = smov 96   ;;  %s1582_s20 = scalar_lea.vmem [#allocation9], %s1541_s29  ;;  %v905_v60 = vld [vmem:[%s1725_s5] ss:$0 sm:$0xff]  ;;  %vm573_vm8 = vcmask 257024  }
  0x7e   : > { %421 = vadd.xlane.f32.xlu0 %v420_v2  ;;  %926 = vmatprep.mubr.msk.bf16.mxu0 %vm1299_vm1, %v1298_v10  ;;  %s1591_s17 = scalar_lea.vmem [#allocation8], %s1541_s29  ;;  %s415_s19 = scalar_lea.vmem [#allocation11], %s1541_s29  ;;  %vm661_vm13 = vcmask 257152  }
  0x7f   : > { %934 = vmatprep.mubr.msk.bf16.mxu1 %vm1299_vm1, %v1298_v10  ;;  %s671_s29 = sand.u32 1, %s1386_s15   ;;  %s910_s23 = sshll.u32 %s1283_s12, 6 }
  0x80   : > { %925 = vmatpush3.bf16.msra.mxu0 %v1039_v11  ;;  %933 = vmatpush3.bf16.msra.mxu1 %v1040_v12  ;;  %s705_s7 = sshll.u32 %s1582_s20, 4  ;;  %s1603_s16 = scalar_lea.hbm %s1728_s8, %s910_s23  ;;  %s1606_s7 = int_to_ptr.vmem [resolvable:$true] %s705_s7 }
  0x81   : > { %v896_v17 = vld [vmem:[%s1756_s1] ss:$0 sm:$0xff]  ;;  %s691_s21 = sshll.u32 %s1591_s17, 4  ;;  %s1612_s28 = scalar_lea.hbm %s1729_s9, %s910_s23  ;;  %s1623_s21 = int_to_ptr.vmem [resolvable:$true] %s691_s21 }
  0x82   : > { %v897_v19 = vld [vmem:[%s1757_s2] ss:$0 sm:$0xff]  ;;  %s1758_s24 = sld [smem:[#allocation22_spill]]  ;;  %s1625_s1 = scalar_lea.sflag [#allocation10], %s671_s29 }
  0x83   : > { %s1145_s2 = scalar_lea.vmem %s1606_s7, 64  ;;  %p1759_p2 = scmp.ne.s32.totalorder %s1750_s22, 0 }
  0x84   : > { %p1146_p11 = scmp.ne.s32.totalorder %s1606_s7, %s1145_s2  ;;  %s1302_s12 = smov [#allocation9]  }
  0x85   : > { %s1149_s15 = sshll.u32 %s1302_s12, 4  ;;  %s1150_s15 = int_to_ptr.vmem [resolvable:$false] %s1149_s15 }
  0x86   : > { %p1147_p13 = pnand %p1146_p11, %p1759_p2  ;;  %s1151_s3 = scalar_lea.vmem %s1150_s15, 128 }
  0x87   : > { %p1152_p7 = scmp.lt.s32.totalorder %s1606_s7, %s1150_s15  ;;  %p1153_p12 = scmp.lt.s32.totalorder %s1151_s3, %s1145_s2 }
  0x88   : > { %s1621_s0 = scalar_lea.hbm %s1758_s24, %s910_s23  ;;  %p1148_p5 = pneg %p1147_p13 }
  0x89   : > { %p1154_p0 = por %p1153_p12, %p1152_p7 }
  0x8b   : > { %p1155_p1 = pnand %p1154_p0, %p1148_p5 }
 0x10b   : > { %v422_v3 = vpop.xlane.xlu0 %421 }
 0x10c   : > { %v424_v4 = vmul.f32 0.03125, %v422_v3 }
 0x10e   : > { %v425_v5 = vsub.f32 %v418_v1, %v424_v4 }
 0x110   : > { %v426_v6 = vmul.f32 %v425_v5, %v425_v5 }
 0x112   : > { %v427_v7 = vsel %vm419_vm0, %v426_v6, 0.0 }
 0x113   : > { %428 = vadd.xlane.f32.xlu0 %v427_v7 }
 0x1a0   : > { %v429_v13 = vpop.xlane.xlu0 %428 }
 0x1a1   : > { %v430_v14 = vmul.f32 0.03125, %v429_v13 }
 0x1a3   : > { %v431_v15 = vadd.f32 1e-05, %v430_v14 }
 0x1a5   : > { %1041 = vrsqrt.f32 %v431_v15 }
 0x1af   : > { %v1042_v16 = vpop.eup %1041 }
 0x1b0   : > { %v433_v18 = vmul.f32 %v1042_v16, %v425_v5 }
 0x1b2   : > { %v441_v20 = vmul.f32 %v896_v17, %v433_v18 }
 0x1b4   : > { %v449_v21 = vadd.f32 %v897_v19, %v441_v20 }
 0x1b6   : > { %v450_v22 = vpack.c.bf16 %v449_v21, %v449_v21 }
 0x1b8   : > { %927 = vmatmul.mubr.msk.bf16.vlgmr.msra.gmra.mrb[0].mxu0 %vm419_vm0, %v450_v22  ;;  %935 = vmatmul.mubr.msk.bf16.vlgmr.msra.gmra.mrb[0].mxu1 %vm419_vm0, %v450_v22 }
 0x28b   : > { %v1563_v23 = vpop.f32.mrb[0].mxu0  ;;  %v1565_v24 = vpop.f32.mrb[0].mxu1 }
 0x28c   : > { %v928_v25 = vpop.f32.mrb[1].mxu0  ;;  %v936_v26 = vpop.f32.mrb[1].mxu1  ;;  %v592_v27 = vmul.f32 %v1565_v24, %v1565_v24  ;;  %v577_v33 = vmul.f32 %v1563_v23, %v1563_v23  ;;  %v915_v39 = vpack.c.bf16 %v1565_v24, %v1565_v24 }
 0x28d   : > { %v507_v28 = vpop.f32.mrb[2].mxu0  ;;  %v563_v29 = vpop.f32.mrb[2].mxu1 }
 0x28e   : > { %643 = vrot.lane.b32.xlu1 %v592_v27, %s1300_s30  ;;  %v929_v30 = vpop.f32.mrb[3].mxu0  ;;  %v937_v31 = vpop.f32.mrb[3].mxu1  ;;  %v593_v32 = vsel %vm578_vm2, %v592_v27, 0.0  ;;  %v579_v34 = vsel %vm578_vm2, %v577_v33, 0.0 }
 0x28f   : > { %594 = vadd.xlane.f32.xlu0 %v593_v32 }
 0x292   : > { %626 = vrot.lane.b32.xlu1 %v577_v33, %s1300_s30  ;;  %s719_s30 = sshll.u32 %s415_s19, 4  ;;  %s1614_s30 = int_to_ptr.vmem [resolvable:$true] %s719_s30 }
 0x2b6   : > { %580 = vadd.xlane.f32.xlu1 %v579_v34 }
 0x300   : > { %v644_v35 = vpop.permute.xlu1 %643 }
 0x301   : > { %v646_v36 = vsel %vm578_vm2, %v644_v35, 0.0 }
 0x302   : > { %647 = vadd.xlane.f32.xlu0 %v646_v36 }
 0x304   : > { %v627_v37 = vpop.permute.xlu1 %626 }
 0x305   : > { %v629_v38 = vsel %vm578_vm2, %v627_v37, 0.0 }
 0x306   : > { %630 = vadd.xlane.f32.xlu0 %v629_v38 }
 0x31c   : > { %v595_v40 = vpop.xlane.xlu0 %594  ;;  %570 = vrot.lane.b32.xlu0 %v915_v39, %s1301_s26 }
 0x31d   : > { %1043 = vrsqrt.f32 %v595_v40  ;;  %vm598_vm3 = vcmp.eq.f32.partialorder %v595_v40, inf  ;;  %v601_v43 = vand.u32 2147483648, %v595_v40  ;;  %vm600_vm4 = vcmp.eq.f32.partialorder %v595_v40, 0.0 }
 0x327   : > { %v1044_v41 = vpop.eup %1043 }
 0x328   : > { %v597_v42 = vmul.f32 %v1044_v41, %v595_v40 }
 0x32a   : > { %v599_v44 = vsel %vm598_vm3, %v595_v40, %v597_v42 }
 0x32b   : > { %v602_v45 = vsel %vm600_vm4, %v601_v43, %v599_v44 }
 0x32c   : > { %v603_v46 = vmax.f32 %v602_v45, 1e-12 }
 0x32e   : > { %1045 = vrcp.f32 %v603_v46 }
 0x338   : > { %v1046_v47 = vpop.eup %1045 }
 0x339   : > { %v605_v49 = vmul.f32 %v1046_v47, %v1565_v24 }
 0x33b   : > { %v622_v50 = vmul.f32 %v906_v48, %v605_v49 }
 0x33d   : > { %v623_v51 = vpack.c.bf16 %v622_v50, %v622_v50 }
 0x33f   : > { %624 = vst.msk [vmem:[%s1582_s20] sm:$0xf] %vm614_vm5, %v623_v51 }
 0x343   : > { %v581_v52 = vpop.xlane.xlu1 %580 }
 0x344   : > { %1047 = vrsqrt.f32 %v581_v52  ;;  %vm584_vm6 = vcmp.eq.f32.partialorder %v581_v52, inf  ;;  %v587_v55 = vand.u32 2147483648, %v581_v52  ;;  %vm586_vm7 = vcmp.eq.f32.partialorder %v581_v52, 0.0 }
 0x34e   : > { %v1048_v53 = vpop.eup %1047 }
 0x34f   : > { %v583_v54 = vmul.f32 %v1048_v53, %v581_v52 }
 0x351   : > { %v585_v56 = vsel %vm584_vm6, %v581_v52, %v583_v54 }
 0x352   : > { %v588_v57 = vsel %vm586_vm7, %v587_v55, %v585_v56 }
 0x353   : > { %v589_v58 = vmax.f32 %v588_v57, 1e-12 }
 0x355   : > { %1049 = vrcp.f32 %v589_v58 }
 0x35f   : > { %v1050_v59 = vpop.eup %1049 }
 0x360   : > { %v591_v61 = vmul.f32 %v1050_v59, %v1563_v23 }
 0x362   : > { %v612_v62 = vmul.f32 %v905_v60, %v591_v61 }
 0x364   : > { %v613_v63 = vpack.c.bf16 %v612_v62, %v612_v62 }
 0x366   : > { %615 = vst.msk [vmem:[%s1591_s17] sm:$0xf] %vm614_vm5, %v613_v63 }
 0x38f   : > { %v648_v0 = vpop.xlane.xlu0 %647 }
 0x390   : > { %1051 = vrsqrt.f32 %v648_v0  ;;  %vm651_vm9 = vcmp.eq.f32.partialorder %v648_v0, inf  ;;  %v654_v5 = vand.u32 2147483648, %v648_v0  ;;  %vm653_vm10 = vcmp.eq.f32.partialorder %v648_v0, 0.0 }
 0x393   : > { %v631_v1 = vpop.xlane.xlu0 %630 }
 0x394   : > { %1053 = vrsqrt.f32 %v631_v1  ;;  %vm634_vm11 = vcmp.eq.f32.partialorder %v631_v1, inf  ;;  %v637_v11 = vand.u32 2147483648, %v631_v1  ;;  %vm636_vm12 = vcmp.eq.f32.partialorder %v631_v1, 0.0 }
 0x397   : > { %v571_v2 = vpop.permute.xlu0 %570 }
 0x398   : > { %574 = vst.msk [vmem:[%s415_s19] sm:$0xf] %vm573_vm8, %v571_v2 }
 0x39a   : > { %v1052_v3 = vpop.eup %1051 }
 0x39b   : > { %v650_v4 = vmul.f32 %v1052_v3, %v648_v0 }
 0x39d   : > { %v652_v6 = vsel %vm651_vm9, %v648_v0, %v650_v4 }
 0x39e   : > { %v1054_v7 = vpop.eup %1053  ;;  %v655_v8 = vsel %vm653_vm10, %v654_v5, %v652_v6 }
 0x39f   : > { %v656_v9 = vmax.f32 %v655_v8, 1e-12  ;;  %v633_v10 = vmul.f32 %v1054_v7, %v631_v1 }
 0x3a1   : > { %1055 = vrcp.f32 %v656_v9  ;;  %v635_v12 = vsel %vm634_vm11, %v631_v1, %v633_v10 }
 0x3a2   : > { %v638_v13 = vsel %vm636_vm12, %v637_v11, %v635_v12 }
 0x3a3   : > { %v639_v14 = vmax.f32 %v638_v13, 1e-12 }
 0x3a5   : > { %1057 = vrcp.f32 %v639_v14 }
 0x3ab   : > { %v1056_v15 = vpop.eup %1055 }
 0x3ac   : > { %v658_v16 = vmul.f32 %v1056_v15, %v1565_v24 }
 0x3ae   : > { %v663_v17 = vmul.f32 %v906_v48, %v658_v16 }
 0x3af   : > { %v1058_v18 = vpop.eup %1057 }
 0x3b0   : > { %v664_v19 = vpack.c.bf16 %v663_v17, %v663_v17  ;;  %v641_v20 = vmul.f32 %v1058_v18, %v1563_v23 }
 0x3b2   : > { %665 = vst.msk [vmem:[%s1582_s20] sm:$0xf] %vm661_vm13, %v664_v19  ;;  %v659_v21 = vmul.f32 %v905_v60, %v641_v20 }
 0x3b3   : > { %1158 = shalt.err (!%p1155_p1)
}
 0x3b4   : > { %s1159_s20 = scalar_lea.hbm %s1603_s16, 64  ;;  %s1163_s19 = scalar_lea.hbm %s1728_s8, 128 }
 0x3b5   : > { %p1160_p6 = scmp.ne.s32.totalorder %s1603_s16, %s1159_s20  ;;  %p1164_p4 = scmp.lt.u32.totalorder %s1603_s16, %s1728_s8 }
 0x3b6   : > { %p1165_p9 = scmp.lt.u32.totalorder %s1163_s19, %s1159_s20  ;;  %p1167_p11 = scmp.lt.u32.totalorder %s1159_s20, %s1603_s16 }
 0x3b7   : > { %p1161_p10 = pnand %p1160_p6, %p1759_p2 }
 0x3b8   : > { %p1166_p8 = por %p1165_p9, %p1164_p4 }
 0x3b9   : > { %p1162_p3 = pneg %p1161_p10 }
 0x3ba   : > { %p1168_p13 = por %p1167_p11, %p1166_p8 }
 0x3bc   : > { %p1169_p5 = pnand %p1168_p13, %p1162_p3 }
 0x3be   : > { %1172 = shalt.err (!%p1169_p5)
}
 0x3bf   : > { %949 = dma.vmem_to_hbm [thread:$0]  (%p1759_p2), %s1606_s7, 64, %s1603_s16, %s1625_s1   ;;  %v660_v22 = vpack.c.bf16 %v659_v21, %v659_v21 }
 0x3c0   : > { %s1173_s2 = scalar_lea.vmem %s1614_s30, 64  ;;  %s1303_s3 = smov [#allocation11]  }
 0x3c1   : > { %p1174_p7 = scmp.ne.s32.totalorder %s1614_s30, %s1173_s2  ;;  %s1177_s15 = sshll.u32 %s1303_s3, 4  ;;  %s1178_s15 = int_to_ptr.vmem [resolvable:$false] %s1177_s15 }
 0x3c2   : > { %s1179_s20 = scalar_lea.vmem %s1178_s15, 128  ;;  %p1180_p1 = scmp.lt.s32.totalorder %s1614_s30, %s1178_s15 }
 0x3c3   : > { %p1175_p12 = pnand %p1174_p7, %p1759_p2  ;;  %p1181_p6 = scmp.lt.s32.totalorder %s1179_s20, %s1173_s2 }
 0x3c5   : > { %p1176_p0 = pneg %p1175_p12  ;;  %p1182_p10 = por %p1181_p6, %p1180_p1 }
 0x3c7   : > { %p1183_p3 = pnand %p1182_p10, %p1176_p0 }
 0x3c9   : > { %1186 = shalt.err (!%p1183_p3)
}
 0x3ca   : > { %s1187_s7 = scalar_lea.hbm %s1612_s28, 64  ;;  %s1191_s23 = scalar_lea.hbm %s1729_s9, 128 }
 0x3cb   : > { %p1188_p4 = scmp.ne.s32.totalorder %s1612_s28, %s1187_s7  ;;  %p1192_p11 = scmp.lt.u32.totalorder %s1612_s28, %s1729_s9 }
 0x3cc   : > { %p1193_p13 = scmp.lt.u32.totalorder %s1191_s23, %s1187_s7  ;;  %p1195_p7 = scmp.lt.u32.totalorder %s1187_s7, %s1612_s28 }
 0x3cd   : > { %p1189_p9 = pnand %p1188_p4, %p1759_p2 }
 0x3ce   : > { %p1194_p5 = por %p1193_p13, %p1192_p11 }
 0x3cf   : > { %p1190_p8 = pneg %p1189_p9 }
 0x3d0   : > { %p1196_p12 = por %p1195_p7, %p1194_p5 }
 0x3d2   : > { %p1197_p0 = pnand %p1196_p12, %p1190_p8 }
 0x3d4   : > { %1200 = shalt.err (!%p1197_p0)
}
 0x3d5   : > { %950 = dma.vmem_to_hbm [thread:$0]  (%p1759_p2), %s1614_s30, 64, %s1612_s28, %s1625_s1   ;;  %662 = vst.msk [vmem:[%s1591_s17] sm:$0xf] %vm661_vm13, %v660_v22 }
 0x3d6   : > { %s667_s12 = scalar_lea.sflag [#allocation4], %s1538_s27  ;;  %s1201_s2 = scalar_lea.vmem %s1623_s21, 64 }
 0x3d7   : > { %p1202_p1 = scmp.ne.s32.totalorder %s1623_s21, %s1201_s2  ;;  %s1304_s3 = smov [#allocation8]  }
 0x3d8   : > { %s1205_s15 = sshll.u32 %s1304_s3, 4  ;;  %s1206_s15 = int_to_ptr.vmem [resolvable:$false] %s1205_s15 }
 0x3d9   : > { %p1203_p6 = pnand %p1202_p1, %p1759_p2  ;;  %s1207_s20 = scalar_lea.vmem %s1206_s15, 128 }
 0x3da   : > { %p1208_p3 = scmp.lt.s32.totalorder %s1623_s21, %s1206_s15  ;;  %p1209_p4 = scmp.lt.s32.totalorder %s1207_s20, %s1201_s2 }
 0x3db   : > { %p1204_p10 = pneg %p1203_p6 }
 0x3dc   : > { %p1210_p9 = por %p1209_p4, %p1208_p3 }
 0x3de   : > { %p1211_p8 = pnand %p1210_p9, %p1204_p10 }
 0x3e0   : > { %1214 = shalt.err (!%p1211_p8)
}
 0x3e1   : > { %s1215_s1 = scalar_lea.hbm %s1621_s0, 64  ;;  %s1219_s30 = scalar_lea.hbm %s1758_s24, 128 }
 0x3e2   : > { %p1216_p11 = scmp.ne.s32.totalorder %s1621_s0, %s1215_s1  ;;  %p1220_p7 = scmp.lt.u32.totalorder %s1621_s0, %s1758_s24 }
 0x3e3   : > { %p1221_p12 = scmp.lt.u32.totalorder %s1219_s30, %s1215_s1  ;;  %p1223_p1 = scmp.lt.u32.totalorder %s1215_s1, %s1621_s0 }
 0x3e4   : > { %p1217_p13 = pnand %p1216_p11, %p1759_p2 }
 0x3e5   : > { %p1222_p0 = por %p1221_p12, %p1220_p7 }
 0x3e6   : > { %p1218_p5 = pneg %p1217_p13 }
 0x3e7   : > { %p1224_p6 = por %p1223_p1, %p1222_p0 }
 0x3e9   : > { %p1225_p10 = pnand %p1224_p6, %p1218_p5 }
 0x3eb   : > { %1228 = shalt.err (!%p1225_p10)
}
 0x3ec   : > { %948 = dma.vmem_to_hbm [thread:$0]  (%p1759_p2), %s1623_s21, 64, %s1621_s0, %s667_s12  }
 0x3ed PF: > { %s1760_s16 = sld [smem:[#allocation16_spill]]  ;;  %s1761_s29 = sld [smem:[#allocation17_spill]] }
 0x3ee   : > { %p1763_p4 = scmp.ge.s32.totalorder %s1291_s14, 2 }
 0x3f3   : > { %s731_s23 = sand.u32 1, %s1760_s16   ;;  %p1762_p3 = scmp.ne.s32.totalorder %s1761_s29, 0 }
 0x3f4   : > { %s732_s19 = scalar_lea.sflag [#allocation4], %s731_s23 }
 0x3f5   : > { %p966_p9 = pnand %p1763_p4, %p1762_p3 }
 0x3f7   : > { %1262 = dma.done.wait (!%p966_p9), %s732_s19, 64  }
 0x3f8   : > { %1264 = vsyncadd (!%p966_p9), %s732_s19, 4294967232  ;;  %s1764_s26 = sadd.s32 4294967294, %s1291_s14  }
 0x3f9   : > { %s740_s2 = sand.u32 1, %s1764_s26  }
 0x3fa   : > { %s741_s3 = scalar_lea.sflag [#allocation10], %s740_s2 }
 0x3fb   : > { %1266 = dma.done.wait (!%p966_p9), %s741_s3, 128  }
 0x3fc   : > { %1268 = vsyncadd (!%p966_p9), %s741_s3, 4294967168  ;;  %s30_s14 = sadd.s32 1, %s1291_s14   ;;  %s1765_s30 = smov %s1275_s10 }
 0x3fd   : > { %p27_p2 = scmp.ge.s32.totalorder %s30_s14, 4   ;;  %s1766_s10 = smov %s1279_s11 }
 0x3fe   : > { %s1767_s11 = smov %s1495_s25  ;;  %s1768_s12 = smov %s1287_s13 }
 0x3ff   : > { %s1769_s13 = smov %s1771_s18  ;;  %29 = sbr.rel (!%p27_p2) target bundleno = 15 (0xf), region = 133 }
 0x406   :  { %755 = vsyncpa [#allocation3], 1 }
 0x407   :  { %757 = vsyncpa [#allocation3 + $0x1], 1 }
 0x408   :  { %758 = vsyncpa [#allocation6], 1 }
 0x409   :  { %759 = vsyncpa [#allocation4], 1 }
 0x40a   :  { %761 = vsyncpa [#allocation4 + $0x1], 1 }
 0x40b   :  { %762 = vsyncpa [#allocation10], 1 }
 0x40c   :  { %764 = vsyncpa [#allocation10 + $0x1], 1 }

// kernel: tpu_custom_call.1
= control target key start
LH: loop header
LB: loop body
LE: loop exit
PB: predicated region body
PF: predicated region fallthrough
CT: control target
= control target key end

     0   :  { %s1720_s0 = inlined_call_operand.hbm [shape: bf16[2,8,32], index: 0, kind: input, shape index: {}]   ;;  %s1721_s1 = inlined_call_operand.vmem [shape: f32[1,32], index: 1, kind: input, shape index: {}]   ;;  %s1722_s2 = inlined_call_operand.vmem [shape: f32[1,32], index: 2, kind: input, shape index: {}]   ;;  %s1723_s3 = inlined_call_operand.hbm [shape: bf16[32,32], index: 3, kind: input, shape index: {}]   ;;  %s1724_s4 = inlined_call_operand.hbm [shape: bf16[32,64], index: 4, kind: input, shape index: {}]   ;;  %s1725_s5 = inlined_call_operand.vmem [shape: f32[1,32], index: 5, kind: input, shape index: {}]   ;;  %s1726_s6 = inlined_call_operand.vmem [shape: f32[1,32], index: 6, kind: input, shape index: {}]   ;;  %s1727_s7 = inlined_call_operand.hbm [shape: bf16[2,8,32], index: 7, kind: output, shape index: {0}]   ;;  %s1728_s8 = inlined_call_operand.hbm [shape: bf16[2,8,32], index: 8, kind: output, shape index: {1}]   ;;  %s1729_s9 = inlined_call_operand.hbm [shape: bf16[2,8,32], index: 9, kind: output, shape index: {2}]  }
   0x1   :  { %1737 = sst [smem:[#allocation18_spill]] %s1720_s0 }
   0x2   :  { %1738 = sst [smem:[#allocation19_spill]] %s1721_s1 }
   0x3   :  { %1739 = sst [smem:[#allocation20_spill]] %s1722_s2 }
   0x4   :  { %1740 = sst [smem:[#allocation21_spill]] %s1723_s3 }
   0x5   :  { %1741 = sst [smem:[#allocation22_spill]] %s1727_s7 }
   0x6   :  { %15 = vsyncpa [#allocation3], 0 }
   0x7   :  { %17 = vsyncpa [#allocation3 + $0x1], 0 }
   0x8   :  { %18 = vsyncpa [#allocation6], 0 }
   0x9   :  { %19 = vsyncpa [#allocation4], 0 }
   0xa   :  { %21 = vsyncpa [#allocation4 + $0x1], 0 }
   0xb   :  { %22 = vsyncpa [#allocation10], 0 }
   0xc   :  { %24 = vsyncpa [#allocation10 + $0x1], 0  ;;  %s1355_s30 = smov 0   ;;  %s1357_s10 = smov 0  }
   0xd   :  { %s1359_s11 = smov 0   ;;  %s1361_s12 = smov 0  }
   0xe   :  { %s1363_s13 = smov 0   ;;  %s1365_s14 = smov 0  }
   0xf LB: > { %1742 = sst [smem:[#allocation16_spill]] %s1271_s30  ;;  %s1386_s15 = sadd.s32 4294967295, %s1291_s14   ;;  %s1291_s14 = sphi %s1365_s14, %s30_s14   ;;  %s1287_s13 = sphi %s1363_s13, %s1769_s13   ;;  %s1283_s12 = sphi %s1361_s12, %s1768_s12   ;;  %s1279_s11 = sphi %s1359_s11, %s1767_s11   ;;  %s1275_s10 = sphi %s1357_s10, %s1766_s10   ;;  %s1271_s30 = sphi %s1355_s30, %s1765_s30  }
  0x10   : > { %s1730_s16 = sadd.s32 4294967294, %s1291_s14   ;;  %p64_p0 = scmp.ne.s32.totalorder %s1275_s10, %s1271_s30 }
  0x11   : > { %p1731_p1 = scmp.eq.s32.totalorder %s1386_s15, 0  ;;  %p222_p3 = scmp.eq.s32.totalorder %s1730_s16, 1 }
  0x12   : > { %p883_p5 = scmp.ge.s32.totalorder %s1291_s14, 1  ;;  %p285_p7 = scmp.lt.s32.totalorder %s1291_s14, 3 }
  0x13   : > { %p1397_p4 = por %p1731_p1, %p64_p0  ;;  %p1402_p6 = por %p222_p3, %p64_p0 }
  0x14   : > { %p1407_p8 = pnand %p883_p5, %p285_p7  ;;  %s1293_s20 = smov [#allocation5]  }
  0x15   : > { %s1743_s17 = scalar_select %p1397_p4, 1, 0 }
  0x16   : > { %s1744_s18 = scalar_select %p1402_p6, 1, 0 }
  0x17   : > { %s303_s21 = sshll.u32 %s1293_s20, 4  ;;  %p954_p9 = pneg %p1407_p8  ;;  %s1411_s21 = int_to_ptr.vmem [resolvable:$true] %s303_s21 }
  0x18   : > { %1745 = sst [smem:[#allocation17_spill]] %s1744_s18  ;;  %s1294_s23 = smov [#allocation7]  }
  0x19   : > { %p1418_p11 = pnand %p954_p9, %p1731_p1  ;;  %s316_s24 = sshll.u32 %s1294_s23, 4  ;;  %s1422_s24 = int_to_ptr.vmem [resolvable:$true] %s316_s24 }
  0x1a   : > { %s1748_s3 = sld [smem:[#allocation21_spill]] }
  0x1b   : > { %p1061_p13 = pneg %p1418_p11 }
  0x20   : > { %s1059_s27 = scalar_lea.hbm %s1748_s3, 256 }
  0x21   : > { %p1060_p12 = scmp.ne.s32.totalorder %s1748_s3, %s1059_s27  ;;  %p1066_p5 = scmp.lt.u32.totalorder %s1059_s27, %s1748_s3 }
  0x23   : > { %p1062_p0 = pnand %p1061_p13, %p1060_p12 }
  0x25   : > { %p1063_p3 = pneg %p1062_p0 }
  0x27   : > { %p1068_p7 = pnand %p1066_p5, %p1063_p3 }
  0x29   : > { %1071 = shalt.err (!%p1068_p7)
}
  0x2a   : > { %s1072_s23 = scalar_lea.vmem %s1411_s21, 256  ;;  %p1080_p2 = scmp.lt.s32.totalorder %s1411_s21, %s1411_s21 }
  0x2b   : > { %p1073_p9 = scmp.ne.s32.totalorder %s1411_s21, %s1072_s23  ;;  %p1081_p12 = scmp.lt.s32.totalorder %s1072_s23, %s1072_s23 }
  0x2d   : > { %p1075_p10 = pnand %p1073_p9, %p1061_p13  ;;  %p1082_p0 = por %p1081_p12, %p1080_p2 }
  0x2f   : > { %p1076_p1 = pneg %p1075_p10 }
  0x31   : > { %p1083_p6 = pnand %p1082_p0, %p1076_p1 }
  0x33   : > { %1086 = shalt.err (!%p1083_p6)
}
  0x34   : > { %s1295_s16 = smov 64   ;;  %s1296_s25 = smov 4  }
  0x35   : > { %957 = dma.hbm_to_vmem [thread:$0]  (!%p1418_p11), %s1748_s3, 256, %s1411_s21, [#allocation6], %s1295_s16, %s1295_s16, %s1296_s25  }
  0x36   : > { %s1087_s20 = scalar_lea.hbm %s1724_s4, 256 }
  0x37   : > { %p1088_p2 = scmp.ne.s32.totalorder %s1724_s4, %s1087_s20  ;;  %p1094_p10 = scmp.lt.u32.totalorder %s1087_s20, %s1724_s4 }
  0x39   : > { %p1090_p1 = pnand %p1088_p2, %p1061_p13 }
  0x3b   : > { %p1091_p6 = pneg %p1090_p1 }
  0x3d   : > { %p1096_p3 = pnand %p1094_p10, %p1091_p6 }
  0x3f   : > { %1099 = shalt.err (!%p1096_p3)
}
  0x40   : > { %s1100_s21 = scalar_lea.vmem %s1422_s24, 256  ;;  %p1108_p12 = scmp.lt.s32.totalorder %s1422_s24, %s1422_s24 }
  0x41   : > { %p1101_p5 = scmp.ne.s32.totalorder %s1422_s24, %s1100_s21  ;;  %p1109_p0 = scmp.lt.s32.totalorder %s1100_s21, %s1100_s21 }
  0x43   : > { %p1103_p7 = pnand %p1101_p5, %p1061_p13  ;;  %p1110_p2 = por %p1109_p0, %p1108_p12 }
  0x45   : > { %p1104_p9 = pneg %p1103_p7 }
  0x47   : > { %p1111_p1 = pnand %p1110_p2, %p1104_p9 }
  0x49   : > { %1114 = shalt.err (!%p1111_p1)
}
  0x4a   : > { %960 = dma.hbm_to_vmem [thread:$0]  (!%p1418_p11), %s1724_s4, 256, %s1422_s24, [#allocation6], %s1295_s16, %s1295_s16, %s1296_s25  }
  0x4b   : > { %s42_s18 = sadd.s32 1, %s1287_s13  ;;  %s51_s26 = sadd.s32 1, %s1279_s11 }
  0x4c   : > { %p44_p13 = scmp.ge.s32.totalorder %s42_s18, 2  ;;  %p58_p6 = scmp.ne.s32.totalorder %s1279_s11, %s1275_s10 }
  0x4d   : > { %p59_p10 = scmp.eq.s32.totalorder %s1291_s14, 0  ;;  %p977_p3 = scmp.lt.s32.totalorder %s1291_s14, 2 }
  0x4e   : > { %s1771_s18 = smov (%p44_p13, %s42_s18), 0  ;;  %p1749_p7 = scmp.eq.s32.totalorder %s1386_s15, 1 }
  0x4f   : > { %p60_p5 = por %p59_p10, %p58_p6  ;;  %s46_s27 = ssub.s32 %s1287_s13, %s1771_s18 }
  0x50   : > { %p1486_p9 = por %p1749_p7, %p58_p6  ;;  %s336_s28 = sand.u32 1, %s1279_s11  }
  0x51   : > { %p49_p12 = scmp.eq.s32.totalorder %s46_s27, 0  ;;  %s887_s24 = sshll.u32 %s336_s28, 2 }
  0x52   : > { %s1750_s22 = scalar_select %p1486_p9, 1, 0 }
  0x53   : > { %s888_s16 = sshll.u32 %s1287_s13, 6  ;;  %s1751_s0 = sld [smem:[#allocation18_spill]] }
  0x54   : > { %s1495_s25 = scalar_select %p49_p12, %s1279_s11, %s51_s26  }
  0x55   : > { %s340_s21 = scalar_lea.vmem [#allocation2], %s887_s24  ;;  %p1504_p11 = pnand %p977_p3, %p60_p5 }
  0x56   : > { %s348_s7 = sshll.u32 %s340_s21, 4  ;;  %s337_s26 = scalar_lea.sflag [#allocation3], %s336_s28  ;;  %s1508_s7 = int_to_ptr.vmem [resolvable:$true] %s348_s7 }
  0x57   : > { %p1117_p2 = pneg %p1504_p11 }
  0x59   : > { %s1500_s23 = scalar_lea.hbm %s1751_s0, %s888_s16  ;;  %s1120_s29 = scalar_lea.hbm %s1751_s0, 128 }
  0x5a   : > { %s1115_s27 = scalar_lea.hbm %s1500_s23, 64  ;;  %p1121_p6 = scmp.lt.u32.totalorder %s1500_s23, %s1751_s0 }
  0x5b   : > { %p1116_p0 = scmp.ne.s32.totalorder %s1500_s23, %s1115_s27  ;;  %p1122_p10 = scmp.lt.u32.totalorder %s1120_s29, %s1115_s27 }
  0x5c   : > { %p1124_p5 = scmp.lt.u32.totalorder %s1115_s27, %s1500_s23 }
  0x5d   : > { %p1118_p1 = pnand %p1117_p2, %p1116_p0  ;;  %p1123_p3 = por %p1122_p10, %p1121_p6 }
  0x5f   : > { %p1119_p13 = pneg %p1118_p1  ;;  %p1125_p7 = por %p1124_p5, %p1123_p3 }
  0x61   : > { %p1126_p12 = pnand %p1125_p7, %p1119_p13 }
  0x63   : > { %1129 = shalt.err (!%p1126_p12)
}
  0x64   : > { %s1130_s28 = scalar_lea.vmem %s1508_s7, 64  ;;  %s1297_s24 = smov [#allocation2]  }
  0x65   : > { %p1131_p0 = scmp.ne.s32.totalorder %s1508_s7, %s1130_s28  ;;  %s1135_s16 = sshll.u32 %s1297_s24, 4  ;;  %s1136_s16 = int_to_ptr.vmem [resolvable:$false] %s1135_s16 }
  0x66   : > { %s1137_s20 = scalar_lea.vmem %s1136_s16, 128  ;;  %p1138_p4 = scmp.lt.s32.totalorder %s1508_s7, %s1136_s16 }
  0x67   : > { %p1133_p1 = pnand %p1131_p0, %p1117_p2  ;;  %p1139_p6 = scmp.lt.s32.totalorder %s1137_s20, %s1130_s28 }
  0x69   : > { %p1134_p9 = pneg %p1133_p1  ;;  %p1140_p10 = por %p1139_p6, %p1138_p4 }
  0x6b   : > { %p1141_p3 = pnand %p1140_p10, %p1134_p9 }
  0x6d   : > { %1144 = shalt.err (!%p1141_p3)
}
  0x6e   : > { %964 = dma.hbm_to_vmem [thread:$0]  (!%p1504_p11), %s1500_s23, 64, %s1508_s7, %s337_s26  }
  0x6f   : > { %357 = sbr.rel (%p1407_p8) target bundleno = 1005 (0x3ed), region = 48  ;;  %s1538_s27 = sand.u32 (!%p1407_p8), 1, %s1275_s10  }
  0x70   : > { %s1541_s29 = sshll.u32 (!%p1407_p8), %s1538_s27, 2  ;;  %s360_s21 = scalar_lea.sflag (!%p1407_p8), [#allocation3], %s1538_s27 }
  0x71   : > { %s363_s28 = scalar_lea.vmem (!%p1407_p8), [#allocation2], %s1541_s29  ;;  %p1753_p4 = scmp.ne.s32.totalorder (!%p1407_p8), %s1743_s17, 0 }
  0x76   : > { %1254 = dma.done.wait (%p1753_p4), %s360_s21, 64  }
  0x77   : > { %1256 = vsyncadd (%p1753_p4), %s360_s21, 4294967232  ;;  %p1754_p9 = scmp.eq.s32.totalorder %s1386_s15, 0 }
  0x79   : > { %1258 = dma.done.wait (%p1754_p9), [#allocation6], 512   ;;  %p1755_p8 = pmov %p1754_p9 }
  0x7a   : > { %vm419_vm0 = vcmask 261120   ;;  %v417_v0 = vld [vmem:[%s363_s28] sm:$0xf]  ;;  %v1037_v8 = vld [vmem:[#allocation5] sm:$0xff]   ;;  %v1038_v9 = vld [vmem:[#allocation7] sm:$0xff]   ;;  %v1298_v10 = vmov 0.0  }
  0x7b   : > { %1260 = vsyncadd (%p1755_p8), [#allocation6], 4294966784  ;;  %v418_v1 = vunpack.c.l.bf16 %v417_v0  ;;  %922 = vmatprep.subr.bf16.mxu0 %v1298_v10  ;;  %930 = vmatprep.subr.bf16.mxu1 %v1298_v10  ;;  %v1039_v11 = vld [vmem:[#allocation5 + $0x8] sm:$0xff]   ;;  %v1040_v12 = vld [vmem:[#allocation7 + $0x8] sm:$0xff]   ;;  %vm1299_vm1 = vmmov 0   ;;  %s1756_s1 = sld [smem:[#allocation19_spill]] }
  0x7c   : > { %923 = vmatpush3.bf16.msra.mxu0 %v1037_v8  ;;  %931 = vmatpush3.bf16.msra.mxu1 %v1038_v9  ;;  %s1757_s2 = sld [smem:[#allocation20_spill]]  ;;  %vm578_vm2 = vcmask 130048   ;;  %s1300_s30 = smov 112   ;;  %v906_v48 = vld [vmem:[%s1726_s6] ss:$0 sm:$0xff]  ;;  %vm614_vm5 = vcmask 125952  }
  0x7d   : > { %v420_v2 = vsel %vm419_vm0, %v418_v1, 0.0  ;;  %924 = vmatprep.subr.bf16.mxu0 %v1298_v10  ;;  %932 = vmatprep.subr.bf16.mxu1 %v1298_v10  ;;  %s1301_s26 = smov 96   ;;  %s1582_s20 = scalar_lea.vmem [#allocation9], %s1541_s29  ;;  %v905_v60 = vld [vmem:[%s1725_s5] ss:$0 sm:$0xff]  ;;  %vm573_vm8 = vcmask 257024  }
  0x7e   : > { %421 = vadd.xlane.f32.xlu0 %v420_v2  ;;  %926 = vmatprep.mubr.msk.bf16.mxu0 %vm1299_vm1, %v1298_v10  ;;  %s1591_s17 = scalar_lea.vmem [#allocation8], %s1541_s29  ;;  %s415_s19 = scalar_lea.vmem [#allocation11], %s1541_s29  ;;  %vm661_vm13 = vcmask 257152  }
  0x7f   : > { %934 = vmatprep.mubr.msk.bf16.mxu1 %vm1299_vm1, %v1298_v10  ;;  %s671_s29 = sand.u32 1, %s1386_s15   ;;  %s910_s23 = sshll.u32 %s1283_s12, 6 }
  0x80   : > { %925 = vmatpush3.bf16.msra.mxu0 %v1039_v11  ;;  %933 = vmatpush3.bf16.msra.mxu1 %v1040_v12  ;;  %s705_s7 = sshll.u32 %s1582_s20, 4  ;;  %s1603_s16 = scalar_lea.hbm %s1728_s8, %s910_s23  ;;  %s1606_s7 = int_to_ptr.vmem [resolvable:$true] %s705_s7 }
  0x81   : > { %v896_v17 = vld [vmem:[%s1756_s1] ss:$0 sm:$0xff]  ;;  %s691_s21 = sshll.u32 %s1591_s17, 4  ;;  %s1612_s28 = scalar_lea.hbm %s1729_s9, %s910_s23  ;;  %s1623_s21 = int_to_ptr.vmem [resolvable:$true] %s691_s21 }
  0x82   : > { %v897_v19 = vld [vmem:[%s1757_s2] ss:$0 sm:$0xff]  ;;  %s1758_s24 = sld [smem:[#allocation22_spill]]  ;;  %s1625_s1 = scalar_lea.sflag [#allocation10], %s671_s29 }
  0x83   : > { %s1145_s2 = scalar_lea.vmem %s1606_s7, 64  ;;  %p1759_p2 = scmp.ne.s32.totalorder %s1750_s22, 0 }
  0x84   : > { %p1146_p11 = scmp.ne.s32.totalorder %s1606_s7, %s1145_s2  ;;  %s1302_s12 = smov [#allocation9]  }
  0x85   : > { %s1149_s15 = sshll.u32 %s1302_s12, 4  ;;  %s1150_s15 = int_to_ptr.vmem [resolvable:$false] %s1149_s15 }
  0x86   : > { %p1147_p13 = pnand %p1146_p11, %p1759_p2  ;;  %s1151_s3 = scalar_lea.vmem %s1150_s15, 128 }
  0x87   : > { %p1152_p7 = scmp.lt.s32.totalorder %s1606_s7, %s1150_s15  ;;  %p1153_p12 = scmp.lt.s32.totalorder %s1151_s3, %s1145_s2 }
  0x88   : > { %s1621_s0 = scalar_lea.hbm %s1758_s24, %s910_s23  ;;  %p1148_p5 = pneg %p1147_p13 }
  0x89   : > { %p1154_p0 = por %p1153_p12, %p1152_p7 }
  0x8b   : > { %p1155_p1 = pnand %p1154_p0, %p1148_p5 }
 0x10b   : > { %v422_v3 = vpop.xlane.xlu0 %421 }
 0x10c   : > { %v424_v4 = vmul.f32 0.03125, %v422_v3 }
 0x10e   : > { %v425_v5 = vsub.f32 %v418_v1, %v424_v4 }
 0x110   : > { %v426_v6 = vmul.f32 %v425_v5, %v425_v5 }
 0x112   : > { %v427_v7 = vsel %vm419_vm0, %v426_v6, 0.0 }
 0x113   : > { %428 = vadd.xlane.f32.xlu0 %v427_v7 }
 0x1a0   : > { %v429_v13 = vpop.xlane.xlu0 %428 }
 0x1a1   : > { %v430_v14 = vmul.f32 0.03125, %v429_v13 }
 0x1a3   : > { %v431_v15 = vadd.f32 1e-05, %v430_v14 }
 0x1a5   : > { %1041 = vrsqrt.f32 %v431_v15 }
 0x1af   : > { %v1042_v16 = vpop.eup %1041 }
 0x1b0   : > { %v433_v18 = vmul.f32 %v1042_v16, %v425_v5 }
 0x1b2   : > { %v441_v20 = vmul.f32 %v896_v17, %v433_v18 }
 0x1b4   : > { %v449_v21 = vadd.f32 %v897_v19, %v441_v20 }
 0x1b6   : > { %v450_v22 = vpack.c.bf16 %v449_v21, %v449_v21 }
 0x1b8   : > { %927 = vmatmul.mubr.msk.bf16.vlgmr.msra.gmra.mrb[0].mxu0 %vm419_vm0, %v450_v22  ;;  %935 = vmatmul.mubr.msk.bf16.vlgmr.msra.gmra.mrb[0].mxu1 %vm419_vm0, %v450_v22 }
 0x28b   : > { %v1563_v23 = vpop.f32.mrb[0].mxu0  ;;  %v1565_v24 = vpop.f32.mrb[0].mxu1 }
 0x28c   : > { %v928_v25 = vpop.f32.mrb[1].mxu0  ;;  %v936_v26 = vpop.f32.mrb[1].mxu1  ;;  %v592_v27 = vmul.f32 %v1565_v24, %v1565_v24  ;;  %v577_v33 = vmul.f32 %v1563_v23, %v1563_v23  ;;  %v915_v39 = vpack.c.bf16 %v1565_v24, %v1565_v24 }
 0x28d   : > { %v507_v28 = vpop.f32.mrb[2].mxu0  ;;  %v563_v29 = vpop.f32.mrb[2].mxu1 }
 0x28e   : > { %643 = vrot.lane.b32.xlu1 %v592_v27, %s1300_s30  ;;  %v929_v30 = vpop.f32.mrb[3].mxu0  ;;  %v937_v31 = vpop.f32.mrb[3].mxu1  ;;  %v593_v32 = vsel %vm578_vm2, %v592_v27, 0.0  ;;  %v579_v34 = vsel %vm578_vm2, %v577_v33, 0.0 }
 0x28f   : > { %594 = vadd.xlane.f32.xlu0 %v593_v32 }
 0x292   : > { %626 = vrot.lane.b32.xlu1 %v577_v33, %s1300_s30  ;;  %s719_s30 = sshll.u32 %s415_s19, 4  ;;  %s1614_s30 = int_to_ptr.vmem [resolvable:$true] %s719_s30 }
 0x2b6   : > { %580 = vadd.xlane.f32.xlu1 %v579_v34 }
 0x300   : > { %v644_v35 = vpop.permute.xlu1 %643 }
 0x301   : > { %v646_v36 = vsel %vm578_vm2, %v644_v35, 0.0 }
 0x302   : > { %647 = vadd.xlane.f32.xlu0 %v646_v36 }
 0x304   : > { %v627_v37 = vpop.permute.xlu1 %626 }
 0x305   : > { %v629_v38 = vsel %vm578_vm2, %v627_v37, 0.0 }
 0x306   : > { %630 = vadd.xlane.f32.xlu0 %v629_v38 }
 0x31c   : > { %v595_v40 = vpop.xlane.xlu0 %594  ;;  %570 = vrot.lane.b32.xlu0 %v915_v39, %s1301_s26 }
 0x31d   : > { %1043 = vrsqrt.f32 %v595_v40  ;;  %vm598_vm3 = vcmp.eq.f32.partialorder %v595_v40, inf  ;;  %v601_v43 = vand.u32 2147483648, %v595_v40  ;;  %vm600_vm4 = vcmp.eq.f32.partialorder %v595_v40, 0.0 }
 0x327   : > { %v1044_v41 = vpop.eup %1043 }
 0x328   : > { %v597_v42 = vmul.f32 %v1044_v41, %v595_v40 }
 0x32a   : > { %v599_v44 = vsel %vm598_vm3, %v595_v40, %v597_v42 }
 0x32b   : > { %v602_v45 = vsel %vm600_vm4, %v601_v43, %v599_v44 }
 0x32c   : > { %v603_v46 = vmax.f32 %v602_v45, 1e-12 }
 0x32e   : > { %1045 = vrcp.f32 %v603_v46 }
 0x338   : > { %v1046_v47 = vpop.eup %1045 }
 0x339   : > { %v605_v49 = vmul.f32 %v1046_v47, %v1565_v24 }
 0x33b   : > { %v622_v50 = vmul.f32 %v906_v48, %v605_v49 }
 0x33d   : > { %v623_v51 = vpack.c.bf16 %v622_v50, %v622_v50 }
 0x33f   : > { %624 = vst.msk [vmem:[%s1582_s20] sm:$0xf] %vm614_vm5, %v623_v51 }
 0x343   : > { %v581_v52 = vpop.xlane.xlu1 %580 }
 0x344   : > { %1047 = vrsqrt.f32 %v581_v52  ;;  %vm584_vm6 = vcmp.eq.f32.partialorder %v581_v52, inf  ;;  %v587_v55 = vand.u32 2147483648, %v581_v52  ;;  %vm586_vm7 = vcmp.eq.f32.partialorder %v581_v52, 0.0 }
 0x34e   : > { %v1048_v53 = vpop.eup %1047 }
 0x34f   : > { %v583_v54 = vmul.f32 %v1048_v53, %v581_v52 }
 0x351   : > { %v585_v56 = vsel %vm584_vm6, %v581_v52, %v583_v54 }
 0x352   : > { %v588_v57 = vsel %vm586_vm7, %v587_v55, %v585_v56 }
 0x353   : > { %v589_v58 = vmax.f32 %v588_v57, 1e-12 }
 0x355   : > { %1049 = vrcp.f32 %v589_v58 }
 0x35f   : > { %v1050_v59 = vpop.eup %1049 }
 0x360   : > { %v591_v61 = vmul.f32 %v1050_v59, %v1563_v23 }
 0x362   : > { %v612_v62 = vmul.f32 %v905_v60, %v591_v61 }
 0x364   : > { %v613_v63 = vpack.c.bf16 %v612_v62, %v612_v62 }
 0x366   : > { %615 = vst.msk [vmem:[%s1591_s17] sm:$0xf] %vm614_vm5, %v613_v63 }
 0x38f   : > { %v648_v0 = vpop.xlane.xlu0 %647 }
 0x390   : > { %1051 = vrsqrt.f32 %v648_v0  ;;  %vm651_vm9 = vcmp.eq.f32.partialorder %v648_v0, inf  ;;  %v654_v5 = vand.u32 2147483648, %v648_v0  ;;  %vm653_vm10 = vcmp.eq.f32.partialorder %v648_v0, 0.0 }
 0x393   : > { %v631_v1 = vpop.xlane.xlu0 %630 }
 0x394   : > { %1053 = vrsqrt.f32 %v631_v1  ;;  %vm634_vm11 = vcmp.eq.f32.partialorder %v631_v1, inf  ;;  %v637_v11 = vand.u32 2147483648, %v631_v1  ;;  %vm636_vm12 = vcmp.eq.f32.partialorder %v631_v1, 0.0 }
 0x397   : > { %v571_v2 = vpop.permute.xlu0 %570 }
 0x398   : > { %574 = vst.msk [vmem:[%s415_s19] sm:$0xf] %vm573_vm8, %v571_v2 }
 0x39a   : > { %v1052_v3 = vpop.eup %1051 }
 0x39b   : > { %v650_v4 = vmul.f32 %v1052_v3, %v648_v0 }
 0x39d   : > { %v652_v6 = vsel %vm651_vm9, %v648_v0, %v650_v4 }
 0x39e   : > { %v1054_v7 = vpop.eup %1053  ;;  %v655_v8 = vsel %vm653_vm10, %v654_v5, %v652_v6 }
 0x39f   : > { %v656_v9 = vmax.f32 %v655_v8, 1e-12  ;;  %v633_v10 = vmul.f32 %v1054_v7, %v631_v1 }
 0x3a1   : > { %1055 = vrcp.f32 %v656_v9  ;;  %v635_v12 = vsel %vm634_vm11, %v631_v1, %v633_v10 }
 0x3a2   : > { %v638_v13 = vsel %vm636_vm12, %v637_v11, %v635_v12 }
 0x3a3   : > { %v639_v14 = vmax.f32 %v638_v13, 1e-12 }
 0x3a5   : > { %1057 = vrcp.f32 %v639_v14 }
 0x3ab   : > { %v1056_v15 = vpop.eup %1055 }
 0x3ac   : > { %v658_v16 = vmul.f32 %v1056_v15, %v1565_v24 }
 0x3ae   : > { %v663_v17 = vmul.f32 %v906_v48, %v658_v16 }
 0x3af   : > { %v1058_v18 = vpop.eup %1057 }
 0x3b0   : > { %v664_v19 = vpack.c.bf16 %v663_v17, %v663_v17  ;;  %v641_v20 = vmul.f32 %v1058_v18, %v1563_v23 }
 0x3b2   : > { %665 = vst.msk [vmem:[%s1582_s20] sm:$0xf] %vm661_vm13, %v664_v19  ;;  %v659_v21 = vmul.f32 %v905_v60, %v641_v20 }
 0x3b3   : > { %1158 = shalt.err (!%p1155_p1)
}
 0x3b4   : > { %s1159_s20 = scalar_lea.hbm %s1603_s16, 64  ;;  %s1163_s19 = scalar_lea.hbm %s1728_s8, 128 }
 0x3b5   : > { %p1160_p6 = scmp.ne.s32.totalorder %s1603_s16, %s1159_s20  ;;  %p1164_p4 = scmp.lt.u32.totalorder %s1603_s16, %s1728_s8 }
 0x3b6   : > { %p1165_p9 = scmp.lt.u32.totalorder %s1163_s19, %s1159_s20  ;;  %p1167_p11 = scmp.lt.u32.totalorder %s1159_s20, %s1603_s16 }
 0x3b7   : > { %p1161_p10 = pnand %p1160_p6, %p1759_p2 }
 0x3b8   : > { %p1166_p8 = por %p1165_p9, %p1164_p4 }
 0x3b9   : > { %p1162_p3 = pneg %p1161_p10 }
 0x3ba   : > { %p1168_p13 = por %p1167_p11, %p1166_p8 }
 0x3bc   : > { %p1169_p5 = pnand %p1168_p13, %p1162_p3 }
 0x3be   : > { %1172 = shalt.err (!%p1169_p5)
}
 0x3bf   : > { %949 = dma.vmem_to_hbm [thread:$0]  (%p1759_p2), %s1606_s7, 64, %s1603_s16, %s1625_s1   ;;  %v660_v22 = vpack.c.bf16 %v659_v21, %v659_v21 }
 0x3c0   : > { %s1173_s2 = scalar_lea.vmem %s1614_s30, 64  ;;  %s1303_s3 = smov [#allocation11]  }
 0x3c1   : > { %p1174_p7 = scmp.ne.s32.totalorder %s1614_s30, %s1173_s2  ;;  %s1177_s15 = sshll.u32 %s1303_s3, 4  ;;  %s1178_s15 = int_to_ptr.vmem [resolvable:$false] %s1177_s15 }
 0x3c2   : > { %s1179_s20 = scalar_lea.vmem %s1178_s15, 128  ;;  %p1180_p1 = scmp.lt.s32.totalorder %s1614_s30, %s1178_s15 }
 0x3c3   : > { %p1175_p12 = pnand %p1174_p7, %p1759_p2  ;;  %p1181_p6 = scmp.lt.s32.totalorder %s1179_s20, %s1173_s2 }
 0x3c5   : > { %p1176_p0 = pneg %p1175_p12  ;;  %p1182_p10 = por %p1181_p6, %p1180_p1 }
 0x3c7   : > { %p1183_p3 = pnand %p1182_p10, %p1176_p0 }
 0x3c9   : > { %1186 = shalt.err (!%p1183_p3)
}
 0x3ca   : > { %s1187_s7 = scalar_lea.hbm %s1612_s28, 64  ;;  %s1191_s23 = scalar_lea.hbm %s1729_s9, 128 }
 0x3cb   : > { %p1188_p4 = scmp.ne.s32.totalorder %s1612_s28, %s1187_s7  ;;  %p1192_p11 = scmp.lt.u32.totalorder %s1612_s28, %s1729_s9 }
 0x3cc   : > { %p1193_p13 = scmp.lt.u32.totalorder %s1191_s23, %s1187_s7  ;;  %p1195_p7 = scmp.lt.u32.totalorder %s1187_s7, %s1612_s28 }
 0x3cd   : > { %p1189_p9 = pnand %p1188_p4, %p1759_p2 }
 0x3ce   : > { %p1194_p5 = por %p1193_p13, %p1192_p11 }
 0x3cf   : > { %p1190_p8 = pneg %p1189_p9 }
 0x3d0   : > { %p1196_p12 = por %p1195_p7, %p1194_p5 }
 0x3d2   : > { %p1197_p0 = pnand %p1196_p12, %p1190_p8 }
 0x3d4   : > { %1200 = shalt.err (!%p1197_p0)
}
 0x3d5   : > { %950 = dma.vmem_to_hbm [thread:$0]  (%p1759_p2), %s1614_s30, 64, %s1612_s28, %s1625_s1   ;;  %662 = vst.msk [vmem:[%s1591_s17] sm:$0xf] %vm661_vm13, %v660_v22 }
 0x3d6   : > { %s667_s12 = scalar_lea.sflag [#allocation4], %s1538_s27  ;;  %s1201_s2 = scalar_lea.vmem %s1623_s21, 64 }
 0x3d7   : > { %p1202_p1 = scmp.ne.s32.totalorder %s1623_s21, %s1201_s2  ;;  %s1304_s3 = smov [#allocation8]  }
 0x3d8   : > { %s1205_s15 = sshll.u32 %s1304_s3, 4  ;;  %s1206_s15 = int_to_ptr.vmem [resolvable:$false] %s1205_s15 }
 0x3d9   : > { %p1203_p6 = pnand %p1202_p1, %p1759_p2  ;;  %s1207_s20 = scalar_lea.vmem %s1206_s15, 128 }
 0x3da   : > { %p1208_p3 = scmp.lt.s32.totalorder %s1623_s21, %s1206_s15  ;;  %p1209_p4 = scmp.lt.s32.totalorder %s1207_s20, %s1201_s2 }
 0x3db   : > { %p1204_p10 = pneg %p1203_p6 }
 0x3dc   : > { %p1210_p9 = por %p1209_p4, %p1208_p3 }
 0x3de   : > { %p1211_p8 = pnand %p1210_p9, %p1204_p10 }
 0x3e0   : > { %1214 = shalt.err (!%p1211_p8)
}
 0x3e1   : > { %s1215_s1 = scalar_lea.hbm %s1621_s0, 64  ;;  %s1219_s30 = scalar_lea.hbm %s1758_s24, 128 }
 0x3e2   : > { %p1216_p11 = scmp.ne.s32.totalorder %s1621_s0, %s1215_s1  ;;  %p1220_p7 = scmp.lt.u32.totalorder %s1621_s0, %s1758_s24 }
 0x3e3   : > { %p1221_p12 = scmp.lt.u32.totalorder %s1219_s30, %s1215_s1  ;;  %p1223_p1 = scmp.lt.u32.totalorder %s1215_s1, %s1621_s0 }
 0x3e4   : > { %p1217_p13 = pnand %p1216_p11, %p1759_p2 }
 0x3e5   : > { %p1222_p0 = por %p1221_p12, %p1220_p7 }
 0x3e6   : > { %p1218_p5 = pneg %p1217_p13 }
 0x3e7   : > { %p1224_p6 = por %p1223_p1, %p1222_p0 }
 0x3e9   : > { %p1225_p10 = pnand %p1224_p6, %p1218_p5 }
 0x3eb   : > { %1228 = shalt.err (!%p1225_p10)
}
 0x3ec   : > { %948 = dma.vmem_to_hbm [thread:$0]  (%p1759_p2), %s1623_s21, 64, %s1621_s0, %s667_s12  }
 0x3ed PF: > { %s1760_s16 = sld [smem:[#allocation16_spill]]  ;;  %s1761_s29 = sld [smem:[#allocation17_spill]] }
 0x3ee   : > { %p1763_p4 = scmp.ge.s32.totalorder %s1291_s14, 2 }
 0x3f3   : > { %s731_s23 = sand.u32 1, %s1760_s16   ;;  %p1762_p3 = scmp.ne.s32.totalorder %s1761_s29, 0 }
 0x3f4   : > { %s732_s19 = scalar_lea.sflag [#allocation4], %s731_s23 }
 0x3f5   : > { %p966_p9 = pnand %p1763_p4, %p1762_p3 }
 0x3f7   : > { %1262 = dma.done.wait (!%p966_p9), %s732_s19, 64  }
 0x3f8   : > { %1264 = vsyncadd (!%p966_p9), %s732_s19, 4294967232  ;;  %s1764_s26 = sadd.s32 4294967294, %s1291_s14  }
 0x3f9   : > { %s740_s2 = sand.u32 1, %s1764_s26  }
 0x3fa   : > { %s741_s3 = scalar_lea.sflag [#allocation10], %s740_s2 }
 0x3fb   : > { %1266 = dma.done.wait (!%p966_p9), %s741_s3, 128  }
 0x3fc   : > { %1268 = vsyncadd (!%p966_p9), %s741_s3, 4294967168  ;;  %s30_s14 = sadd.s32 1, %s1291_s14   ;;  %s1765_s30 = smov %s1275_s10 }
 0x3fd   : > { %p27_p2 = scmp.ge.s32.totalorder %s30_s14, 4   ;;  %s1766_s10 = smov %s1279_s11 }
 0x3fe   : > { %s1767_s11 = smov %s1495_s25  ;;  %s1768_s12 = smov %s1287_s13 }
 0x3ff   : > { %s1769_s13 = smov %s1771_s18  ;;  %29 = sbr.rel (!%p27_p2) target bundleno = 15 (0xf), region = 133 }
 0x406   :  { %755 = vsyncpa [#allocation3], 1 }
 0x407   :  { %757 = vsyncpa [#allocation3 + $0x1], 1 }
 0x408   :  { %758 = vsyncpa [#allocation6], 1 }
 0x409   :  { %759 = vsyncpa [#allocation4], 1 }
 0x40a   :  { %761 = vsyncpa [#allocation4 + $0x1], 1 }
 0x40b   :  { %762 = vsyncpa [#allocation10], 1 }
 0x40c   :  { %764 = vsyncpa [#allocation10 + $0x1], 1 }

</bundles_post_ra>
